<compile_context>
chip_gen: v7x
topology: tpu7x:2x2x1
jax: 0.10.0
libtpu: 0.0.40
codegen_flags: <defaults>
</compile_context>

<pallas_src>
import math

import numpy as np
import jax
import jax.numpy as jnp
from jax.experimental import pallas as pl
from jax.experimental.pallas import tpu as pltpu


# ----------------------------------------------------------------------------
# Model config (small, deterministic, self-contained)
# ----------------------------------------------------------------------------
B = 2            # batch
S = 8            # sequence length
T = B * S        # folded token slab (one grid step)
H = 32           # hidden size ("bert_dim")
NH = 2           # attention heads
DH = H // NH     # head dim
FF = 64          # feed-forward intermediate size
NL = 2           # number of encoder layers
VOCAB = 50
TYPE_VOCAB = 2
MAX_POS = 16
LABELS = 3       # label_num
LN_EPS = 1e-12
LP = 128         # lane-padded label dim -> lane-dense output store


def _round8(n):
  return -(-n // 8) * 8


# ----------------------------------------------------------------------------
# Static slab layouts (row offsets are Python constants used at trace time)
# ----------------------------------------------------------------------------
def _build_w_layout():
  layout, row = {}, 0

  def add(name, nr, nc):
    nonlocal row
    layout[name] = (row, nr, nc)
    row += _round8(nr)

  for l in range(NL):
    for h in range(NH):
      add(f"wq{l}_{h}", H, DH)
      add(f"wk{l}_{h}", H, DH)
      add(f"wv{l}_{h}", H, DH)
    add(f"wo{l}", H, H)
    add(f"w1{l}", H, FF)
    add(f"w2{l}", FF, H)
  add("pool_w", H, H)
  add("head_w", H, LP)          # real (H, LABELS), zero-padded to 128 lanes
  return layout, _round8(row)


def _build_b_layout():
  layout, row = {}, 0

  def add(name, nc):
    nonlocal row
    layout[name] = (row, nc)
    row += 1

  add("emb_g", H)
  add("emb_b", H)
  for l in range(NL):
    for h in range(NH):
      add(f"bq{l}_{h}", DH)
      add(f"bk{l}_{h}", DH)
      add(f"bv{l}_{h}", DH)
    add(f"bo{l}", H)
    add(f"ln1g{l}", H)
    add(f"ln1b{l}", H)
    add(f"b1{l}", FF)
    add(f"b2{l}", H)
    add(f"ln2g{l}", H)
    add(f"ln2b{l}", H)
  add("pool_b", H)
  add("head_b", LP)
  return layout, _round8(row)


W_LAYOUT, W_ROWS = _build_w_layout()
B_LAYOUT, B_ROWS = _build_b_layout()


# ----------------------------------------------------------------------------
# Fused Pallas kernel: one grid step processes ALL B*S tokens
# ----------------------------------------------------------------------------
def _nli_fused_kernel(emb_ref, bias_ref, w_ref, b_ref, logits_ref):
  f32 = jnp.float32
  bf16 = jnp.bfloat16

  def W(name):                              # static weight-ref slice (free)
    r, nr, nc = W_LAYOUT[name]
    return w_ref[r:r + nr, 0:nc]            # bf16 (nr, nc)

  def Bv(name):                             # static bias/LN-ref slice
    r, nc = B_LAYOUT[name]
    return b_ref[r:r + 1, 0:nc]             # f32 (1, nc)

  def layer_norm(hd, g, b):
    mu = jnp.sum(hd, axis=-1, keepdims=True) * (1.0 / H)
    msq = jnp.sum(hd * hd, axis=-1, keepdims=True) * (1.0 / H)
    var = msq - mu * mu
    return (hd - mu) * jax.lax.rsqrt(var + LN_EPS) * g + b

  # --- embedding LayerNorm ---
  x = layer_norm(emb_ref[...], Bv("emb_g"), Bv("emb_b"))      # (T, H) f32

  # block-diagonal (cross-batch) + key-padding additive bias; hoisted load
  attn_bias = bias_ref[...]                                   # (T, T) f32
  scale = 1.0 / math.sqrt(DH)
  gelu_c = math.sqrt(2.0 / math.pi)

  for l in range(NL):                       # unrolled at trace time (NL=2)
    xb = x.astype(bf16)

    # ---------------- self attention (per-head weight slices, no value
    #                  slicing at unaligned lane offsets) ----------------
    ctx_heads = []
    for h in range(NH):
      q = jnp.dot(xb, W(f"wq{l}_{h}"), preferred_element_type=f32) + Bv(f"bq{l}_{h}")
      k = jnp.dot(xb, W(f"wk{l}_{h}"), preferred_element_type=f32) + Bv(f"bk{l}_{h}")
      v = jnp.dot(xb, W(f"wv{l}_{h}"), preferred_element_type=f32) + Bv(f"bv{l}_{h}")
      s = jax.lax.dot_general(q.astype(bf16), k.astype(bf16),
                              (((1,), (1,)), ((), ())),
                              preferred_element_type=f32) * scale + attn_bias
      m = jnp.max(s, axis=-1, keepdims=True)
      e = jnp.exp(s - m)
      p = e * pl.reciprocal(jnp.sum(e, axis=-1, keepdims=True), approx=True)
      ctx_heads.append(jnp.dot(p.astype(bf16), v.astype(bf16),
                               preferred_element_type=f32))   # (T, DH)

    ctx = jnp.concatenate(ctx_heads, axis=-1)                 # (T, H)
    attn = jnp.dot(ctx.astype(bf16), W(f"wo{l}"),
                   preferred_element_type=f32) + Bv(f"bo{l}")  # (T, H)
    x = layer_norm(attn + x, Bv(f"ln1g{l}"), Bv(f"ln1b{l}"))

    # ---------------- feed forward ----------------
    h1 = jnp.dot(x.astype(bf16), W(f"w1{l}"),
                 preferred_element_type=f32) + Bv(f"b1{l}")    # (T, FF)
    # TODO(synk): BERT's exact erf-GELU is approximated with the tanh form.
    h1 = 0.5 * h1 * (1.0 + jnp.tanh(gelu_c * (h1 + 0.044715 * h1 * h1 * h1)))
    h2 = jnp.dot(h1.astype(bf16), W(f"w2{l}"),
                 preferred_element_type=f32) + Bv(f"b2{l}")    # (T, H)
    x = layer_norm(h2 + x, Bv(f"ln2g{l}"), Bv(f"ln2b{l}"))

  # --- pooler + NLI head (computed for every token; wrapper keeps CLS rows) ---
  pooled = jnp.tanh(jnp.dot(x.astype(bf16), W("pool_w"),
                            preferred_element_type=f32) + Bv("pool_b"))  # (T, H)
  logits_ref[...] = jnp.dot(pooled.astype(bf16), W("head_w"),
                            preferred_element_type=f32) + Bv("head_b")   # (T, LP)


# ----------------------------------------------------------------------------
# Parameter init (deterministic, synthetic)
# ----------------------------------------------------------------------------
def init_params(key):
  def nrm(k, shape, scale=0.02):
    return scale * jax.random.normal(k, shape, dtype=jnp.float32)

  keys = iter(jax.random.split(key, 64))
  p = {
      "word_emb": nrm(next(keys), (VOCAB, H)),
      "pos_emb": nrm(next(keys), (MAX_POS, H)),
      "type_emb": nrm(next(keys), (TYPE_VOCAB, H)),
      "emb_ln_g": jnp.ones((H,), jnp.float32),
      "emb_ln_b": jnp.zeros((H,), jnp.float32),
      "layers": [],
      "pool_w": nrm(next(keys), (H, H)),
      "pool_b": jnp.zeros((H,), jnp.float32),
      "head_w": nrm(next(keys), (H, LABELS)),
      "head_b": jnp.zeros((LABELS,), jnp.float32),
  }
  for _ in range(NL):
    p["layers"].append({
        "wqkv": nrm(next(keys), (H, 3 * H)),
        "bqkv": jnp.zeros((3 * H,), jnp.float32),
        "wo": nrm(next(keys), (H, H)),
        "bo": jnp.zeros((H,), jnp.float32),
        "ln1_g": jnp.ones((H,), jnp.float32),
        "ln1_b": jnp.zeros((H,), jnp.float32),
        "w1": nrm(next(keys), (H, FF)),
        "b1": jnp.zeros((FF,), jnp.float32),
        "w2": nrm(next(keys), (FF, H)),
        "b2": jnp.zeros((H,), jnp.float32),
        "ln2_g": jnp.ones((H,), jnp.float32),
        "ln2_b": jnp.zeros((H,), jnp.float32),
    })
  return p


# ----------------------------------------------------------------------------
# One-time packing (OUTSIDE jit): two slabs + embedding tables + const mask
# ----------------------------------------------------------------------------
def pack_params(params):
  def npf(x):
    return np.asarray(x, np.float32)

  w = np.zeros((W_ROWS, 128), np.float32)
  b = np.zeros((B_ROWS, 128), np.float32)

  def put_w(name, mat):
    r, _, _ = W_LAYOUT[name]
    mat = npf(mat)
    w[r:r + mat.shape[0], :mat.shape[1]] = mat

  def put_b(name, vec):
    r, _ = B_LAYOUT[name]
    vec = npf(vec)
    b[r, :vec.shape[0]] = vec

  put_b("emb_g", params["emb_ln_g"])
  put_b("emb_b", params["emb_ln_b"])
  for l, lp in enumerate(params["layers"]):
    wqkv, bqkv = npf(lp["wqkv"]), npf(lp["bqkv"])
    for h in range(NH):
      put_w(f"wq{l}_{h}", wqkv[:, h * DH:(h + 1) * DH])
      put_w(f"wk{l}_{h}", wqkv[:, H + h * DH:H + (h + 1) * DH])
      put_w(f"wv{l}_{h}", wqkv[:, 2 * H + h * DH:2 * H + (h + 1) * DH])
      put_b(f"bq{l}_{h}", bqkv[h * DH:(h + 1) * DH])
      put_b(f"bk{l}_{h}", bqkv[H + h * DH:H + (h + 1) * DH])
      put_b(f"bv{l}_{h}", bqkv[2 * H + h * DH:2 * H + (h + 1) * DH])
    put_w(f"wo{l}", lp["wo"])
    put_b(f"bo{l}", lp["bo"])
    put_b(f"ln1g{l}", lp["ln1_g"])
    put_b(f"ln1b{l}", lp["ln1_b"])
    put_w(f"w1{l}", lp["w1"])
    put_b(f"b1{l}", lp["b1"])
    put_w(f"w2{l}", lp["w2"])
    put_b(f"b2{l}", lp["b2"])
    put_b(f"ln2g{l}", lp["ln2_g"])
    put_b(f"ln2b{l}", lp["ln2_b"])
  put_w("pool_w", params["pool_w"])
  put_b("pool_b", params["pool_b"])
  put_w("head_w", params["head_w"])   # (H, 3) into a 128-lane row range
  put_b("head_b", params["head_b"])

  # block-diagonal bias: 0 within a batch element, -1e9 across batch elements
  bid = np.repeat(np.arange(B), S)
  block_mask = np.where(bid[:, None] == bid[None, :], 0.0, -1e9).astype(np.float32)

  return {
      "word_emb": params["word_emb"],
      "pos_emb": params["pos_emb"],
      "type_emb": params["type_emb"],
      "w_slab": jnp.asarray(w, dtype=jnp.bfloat16),
      "b_slab": jnp.asarray(b, dtype=jnp.float32),
      "block_mask": jnp.asarray(block_mask),
  }


# ----------------------------------------------------------------------------
# NLImodel.forward equivalent (returns (logits, probs) for the CLS pooled vec)
# ----------------------------------------------------------------------------
def nli_forward(packed, input_ids, attention_mask, token_type_ids):
  # --- BERT embeddings: table gathers stay in plain JAX (glue) ---
  emb = (packed["word_emb"][input_ids]
         + packed["pos_emb"][None, :S, :]
         + packed["type_emb"][token_type_ids])                 # (B, S, H)
  emb = emb.reshape(T, H)

  # additive attention bias: key padding + block-diagonal (no cross-batch)
  key_bias = (1.0 - attention_mask.astype(jnp.float32)) * -1e9   # (B, S)
  attn_bias = packed["block_mask"] + key_bias.reshape(1, T)      # (T, T)

  # Single grid step: whole (B*S, H) slab on one TensorCore.
  # (v7x: optionally benchmark grid=(B,) + dimension_semantics=("parallel",).)
  logits_full = pl.pallas_call(
      _nli_fused_kernel,
      grid=(1,),
      in_specs=[
          pl.BlockSpec((T, H), lambda i: (0, 0)),              # tokens
          pl.BlockSpec((T, T), lambda i: (0, 0)),              # attention bias
          pl.BlockSpec((W_ROWS, 128), lambda i: (0, 0)),       # bf16 weight slab
          pl.BlockSpec((B_ROWS, 128), lambda i: (0, 0)),       # f32 bias/LN slab
      ],
      out_specs=pl.BlockSpec((T, LP), lambda i: (0, 0)),
      out_shape=jax.ShapeDtypeStruct((T, LP), jnp.float32),
      compiler_params=pltpu.CompilerParams(
          dimension_semantics=("arbitrary",)),
  )(emb, attn_bias, packed["w_slab"], packed["b_slab"])

  # keep the CLS (token 0) row per batch element and the real label columns
  logits = logits_full.reshape(B, S, LP)[:, 0, :LABELS]
  probs = jax.nn.softmax(logits, axis=-1)      # exact 3-way softmax in XLA
  # TODO(synk): nn.Dropout(0.5) is identity at inference; deterministic eval here.
  return logits, probs


# ----------------------------------------------------------------------------
if __name__ == "__main__":
  key = jax.random.PRNGKey(0)
  kp, ki = jax.random.split(key)
  params = init_params(kp)
  packed = pack_params(params)        # hoisted out of the jitted forward (once)

  input_ids = jax.random.randint(ki, (B, S), 0, VOCAB, dtype=jnp.int32)
  attention_mask = jnp.concatenate(
      [jnp.ones((B, S - 2), jnp.int32), jnp.zeros((B, 2), jnp.int32)], axis=1)
  token_type_ids = jnp.concatenate(
      [jnp.zeros((B, S // 2), jnp.int32), jnp.ones((B, S // 2), jnp.int32)], axis=1)

  fwd = jax.jit(nli_forward)
  logits, probs = fwd(packed, input_ids, attention_mask, token_type_ids)
  jax.block_until_ready((logits, probs))

  assert logits.shape == (B, LABELS) and probs.shape == (B, LABELS)
  assert bool(jnp.all(jnp.isfinite(logits))) and bool(jnp.all(jnp.isfinite(probs)))
  assert bool(jnp.all(probs >= 0.0)) and bool(jnp.all(probs <= 1.0))
  assert bool(jnp.allclose(jnp.sum(probs, axis=1), 1.0, atol=1e-5))
  print("KERNEL_OK")
</pallas_src>

<mosaic_0001>
module attributes {stable_mosaic.version = 11 : i64} {
  func.func @_nli_fused_kernel(%arg0: i32, %arg1: memref<16x32xf32, #tpu.memory_space<vmem>>, %arg2: memref<16x16xf32, #tpu.memory_space<vmem>>, %arg3: memref<704x128xbf16, #tpu.memory_space<vmem>>, %arg4: memref<32x128xf32, #tpu.memory_space<vmem>>, %arg5: memref<16x128xf32, #tpu.memory_space<vmem>>) attributes {dimension_semantics = [#tpu.dimension_semantics<arbitrary>], iteration_bounds = array<i64: 1>, scalar_prefetch = 0 : i64, scratch_operands = 0 : i64, tpu.core_type = #tpu.core_type<tc>, window_params = [{pipeline_mode = #tpu.pipeline_mode<synchronous>, transform_indices = @transform_0, window_bounds = array<i64: 16, 32>}, {pipeline_mode = #tpu.pipeline_mode<synchronous>, transform_indices = @transform_1, window_bounds = array<i64: 16, 16>}, {pipeline_mode = #tpu.pipeline_mode<synchronous>, transform_indices = @transform_2, window_bounds = array<i64: 704, 128>}, {pipeline_mode = #tpu.pipeline_mode<synchronous>, transform_indices = @transform_3, window_bounds = array<i64: 32, 128>}, {pipeline_mode = #tpu.pipeline_mode<synchronous>, transform_indices = @transform_4, window_bounds = array<i64: 16, 128>}]} {
    %c0 = arith.constant 0 : index
    %c0_0 = arith.constant 0 : index
    %0 = vector.load %arg1[%c0, %c0_0] : memref<16x32xf32, #tpu.memory_space<vmem>>, vector<16x32xf32>
    %c0_1 = arith.constant 0 : index
    %c0_2 = arith.constant 0 : index
    %1 = vector.load %arg4[%c0_1, %c0_2] : memref<32x128xf32, #tpu.memory_space<vmem>>, vector<1x32xf32>
    %c1 = arith.constant 1 : index
    %c0_3 = arith.constant 0 : index
    %2 = vector.load %arg4[%c1, %c0_3] : memref<32x128xf32, #tpu.memory_space<vmem>>, vector<1x32xf32>
    %cst = arith.constant dense<0.000000e+00> : vector<16xf32>
    %3 = vector.multi_reduction <add>, %0, %cst [1] : vector<16x32xf32> to vector<16xf32>
    %4 = vector.shape_cast %3 : vector<16xf32> to vector<16x1xf32>
    %cst_4 = arith.constant 3.125000e-02 : f32
    %5 = vector.broadcast %cst_4 : f32 to vector<16x1xf32>
    %6 = arith.mulf %4, %5 : vector<16x1xf32>
    %7 = arith.mulf %0, %0 : vector<16x32xf32>
    %cst_5 = arith.constant dense<0.000000e+00> : vector<16xf32>
    %8 = vector.multi_reduction <add>, %7, %cst_5 [1] : vector<16x32xf32> to vector<16xf32>
    %9 = vector.shape_cast %8 : vector<16xf32> to vector<16x1xf32>
    %cst_6 = arith.constant 3.125000e-02 : f32
    %10 = vector.broadcast %cst_6 : f32 to vector<16x1xf32>
    %11 = arith.mulf %9, %10 : vector<16x1xf32>
    %12 = arith.mulf %6, %6 : vector<16x1xf32>
    %13 = arith.subf %11, %12 : vector<16x1xf32>
    %14 = vector.broadcast %6 : vector<16x1xf32> to vector<16x32xf32>
    %15 = arith.subf %0, %14 : vector<16x32xf32>
    %cst_7 = arith.constant 9.99999996E-13 : f32
    %16 = vector.broadcast %cst_7 : f32 to vector<16x1xf32>
    %17 = arith.addf %13, %16 : vector<16x1xf32>
    %18 = math.rsqrt %17 : vector<16x1xf32>
    %19 = vector.broadcast %18 : vector<16x1xf32> to vector<16x32xf32>
    %20 = arith.mulf %15, %19 : vector<16x32xf32>
    %21 = vector.broadcast %1 : vector<1x32xf32> to vector<16x32xf32>
    %22 = arith.mulf %20, %21 : vector<16x32xf32>
    %23 = vector.broadcast %2 : vector<1x32xf32> to vector<16x32xf32>
    %24 = arith.addf %22, %23 : vector<16x32xf32>
    %c0_8 = arith.constant 0 : index
    %c0_9 = arith.constant 0 : index
    %25 = vector.load %arg2[%c0_8, %c0_9] : memref<16x16xf32, #tpu.memory_space<vmem>>, vector<16x16xf32>
    %26 = arith.truncf %24 : vector<16x32xf32> to vector<16x32xbf16>
    %c0_10 = arith.constant 0 : index
    %c0_11 = arith.constant 0 : index
    %27 = vector.load %arg3[%c0_10, %c0_11] : memref<704x128xbf16, #tpu.memory_space<vmem>>, vector<32x16xbf16>
    %cst_12 = arith.constant dense<0.000000e+00> : vector<16x16xf32>
    %28 = tpu.matmul %26, %27, %cst_12 {dimension_numbers = #tpu.dot_dimension_numbers<[1], [0], [0], [1], [0, 0, 1, 1], [], []>} : vector<16x32xbf16>, vector<32x16xbf16>, vector<16x16xf32> -> vector<16x16xf32>
    %c2 = arith.constant 2 : index
    %c0_13 = arith.constant 0 : index
    %29 = vector.load %arg4[%c2, %c0_13] : memref<32x128xf32, #tpu.memory_space<vmem>>, vector<1x16xf32>
    %30 = vector.broadcast %29 : vector<1x16xf32> to vector<16x16xf32>
    %31 = arith.addf %28, %30 : vector<16x16xf32>
    %c32 = arith.constant 32 : index
    %c0_14 = arith.constant 0 : index
    %32 = vector.load %arg3[%c32, %c0_14] : memref<704x128xbf16, #tpu.memory_space<vmem>>, vector<32x16xbf16>
    %cst_15 = arith.constant dense<0.000000e+00> : vector<16x16xf32>
    %33 = tpu.matmul %26, %32, %cst_15 {dimension_numbers = #tpu.dot_dimension_numbers<[1], [0], [0], [1], [0, 0, 1, 1], [], []>} : vector<16x32xbf16>, vector<32x16xbf16>, vector<16x16xf32> -> vector<16x16xf32>
    %c3 = arith.constant 3 : index
    %c0_16 = arith.constant 0 : index
    %34 = vector.load %arg4[%c3, %c0_16] : memref<32x128xf32, #tpu.memory_space<vmem>>, vector<1x16xf32>
    %35 = vector.broadcast %34 : vector<1x16xf32> to vector<16x16xf32>
    %36 = arith.addf %33, %35 : vector<16x16xf32>
    %c64 = arith.constant 64 : index
    %c0_17 = arith.constant 0 : index
    %37 = vector.load %arg3[%c64, %c0_17] : memref<704x128xbf16, #tpu.memory_space<vmem>>, vector<32x16xbf16>
    %cst_18 = arith.constant dense<0.000000e+00> : vector<16x16xf32>
    %38 = tpu.matmul %26, %37, %cst_18 {dimension_numbers = #tpu.dot_dimension_numbers<[1], [0], [0], [1], [0, 0, 1, 1], [], []>} : vector<16x32xbf16>, vector<32x16xbf16>, vector<16x16xf32> -> vector<16x16xf32>
    %c4 = arith.constant 4 : index
    %c0_19 = arith.constant 0 : index
    %39 = vector.load %arg4[%c4, %c0_19] : memref<32x128xf32, #tpu.memory_space<vmem>>, vector<1x16xf32>
    %40 = vector.broadcast %39 : vector<1x16xf32> to vector<16x16xf32>
    %41 = arith.addf %38, %40 : vector<16x16xf32>
    %42 = arith.truncf %31 : vector<16x16xf32> to vector<16x16xbf16>
    %43 = arith.truncf %36 : vector<16x16xf32> to vector<16x16xbf16>
    %cst_20 = arith.constant dense<0.000000e+00> : vector<16x16xf32>
    %44 = tpu.matmul %42, %43, %cst_20 {dimension_numbers = #tpu.dot_dimension_numbers<[1], [1], [0], [0], [0, 0, 1, 0], [], []>} : vector<16x16xbf16>, vector<16x16xbf16>, vector<16x16xf32> -> vector<16x16xf32>
    %cst_21 = arith.constant 2.500000e-01 : f32
    %45 = vector.broadcast %cst_21 : f32 to vector<16x16xf32>
    %46 = arith.mulf %44, %45 : vector<16x16xf32>
    %47 = arith.addf %46, %25 : vector<16x16xf32>
    %cst_22 = arith.constant dense<0xFF800000> : vector<16xf32>
    %48 = vector.multi_reduction <maximumf>, %47, %cst_22 [1] : vector<16x16xf32> to vector<16xf32>
    %49 = vector.shape_cast %48 : vector<16xf32> to vector<16x1xf32>
    %50 = vector.broadcast %49 : vector<16x1xf32> to vector<16x16xf32>
    %51 = arith.subf %47, %50 : vector<16x16xf32>
    %52 = math.exp %51 : vector<16x16xf32>
    %cst_23 = arith.constant dense<0.000000e+00> : vector<16xf32>
    %53 = vector.multi_reduction <add>, %52, %cst_23 [1] : vector<16x16xf32> to vector<16xf32>
    %54 = vector.shape_cast %53 : vector<16xf32> to vector<16x1xf32>
    %55 = tpu.reciprocal %54 {approx = true} : vector<16x1xf32> -> vector<16x1xf32>
    %56 = vector.broadcast %55 : vector<16x1xf32> to vector<16x16xf32>
    %57 = arith.mulf %52, %56 : vector<16x16xf32>
    %58 = arith.truncf %57 : vector<16x16xf32> to vector<16x16xbf16>
    %59 = arith.truncf %41 : vector<16x16xf32> to vector<16x16xbf16>
    %cst_24 = arith.constant dense<0.000000e+00> : vector<16x16xf32>
    %60 = tpu.matmul %58, %59, %cst_24 {dimension_numbers = #tpu.dot_dimension_numbers<[1], [0], [0], [1], [0, 0, 1, 1], [], []>} : vector<16x16xbf16>, vector<16x16xbf16>, vector<16x16xf32> -> vector<16x16xf32>
    %c96 = arith.constant 96 : index
    %c0_25 = arith.constant 0 : index
    %61 = vector.load %arg3[%c96, %c0_25] : memref<704x128xbf16, #tpu.memory_space<vmem>>, vector<32x16xbf16>
    %cst_26 = arith.constant dense<0.000000e+00> : vector<16x16xf32>
    %62 = tpu.matmul %26, %61, %cst_26 {dimension_numbers = #tpu.dot_dimension_numbers<[1], [0], [0], [1], [0, 0, 1, 1], [], []>} : vector<16x32xbf16>, vector<32x16xbf16>, vector<16x16xf32> -> vector<16x16xf32>
    %c5 = arith.constant 5 : index
    %c0_27 = arith.constant 0 : index
    %63 = vector.load %arg4[%c5, %c0_27] : memref<32x128xf32, #tpu.memory_space<vmem>>, vector<1x16xf32>
    %64 = vector.broadcast %63 : vector<1x16xf32> to vector<16x16xf32>
    %65 = arith.addf %62, %64 : vector<16x16xf32>
    %c128 = arith.constant 128 : index
    %c0_28 = arith.constant 0 : index
    %66 = vector.load %arg3[%c128, %c0_28] : memref<704x128xbf16, #tpu.memory_space<vmem>>, vector<32x16xbf16>
    %cst_29 = arith.constant dense<0.000000e+00> : vector<16x16xf32>
    %67 = tpu.matmul %26, %66, %cst_29 {dimension_numbers = #tpu.dot_dimension_numbers<[1], [0], [0], [1], [0, 0, 1, 1], [], []>} : vector<16x32xbf16>, vector<32x16xbf16>, vector<16x16xf32> -> vector<16x16xf32>
    %c6 = arith.constant 6 : index
    %c0_30 = arith.constant 0 : index
    %68 = vector.load %arg4[%c6, %c0_30] : memref<32x128xf32, #tpu.memory_space<vmem>>, vector<1x16xf32>
    %69 = vector.broadcast %68 : vector<1x16xf32> to vector<16x16xf32>
    %70 = arith.addf %67, %69 : vector<16x16xf32>
    %c160 = arith.constant 160 : index
    %c0_31 = arith.constant 0 : index
    %71 = vector.load %arg3[%c160, %c0_31] : memref<704x128xbf16, #tpu.memory_space<vmem>>, vector<32x16xbf16>
    %cst_32 = arith.constant dense<0.000000e+00> : vector<16x16xf32>
    %72 = tpu.matmul %26, %71, %cst_32 {dimension_numbers = #tpu.dot_dimension_numbers<[1], [0], [0], [1], [0, 0, 1, 1], [], []>} : vector<16x32xbf16>, vector<32x16xbf16>, vector<16x16xf32> -> vector<16x16xf32>
    %c7 = arith.constant 7 : index
    %c0_33 = arith.constant 0 : index
    %73 = vector.load %arg4[%c7, %c0_33] : memref<32x128xf32, #tpu.memory_space<vmem>>, vector<1x16xf32>
    %74 = vector.broadcast %73 : vector<1x16xf32> to vector<16x16xf32>
    %75 = arith.addf %72, %74 : vector<16x16xf32>
    %76 = arith.truncf %65 : vector<16x16xf32> to vector<16x16xbf16>
    %77 = arith.truncf %70 : vector<16x16xf32> to vector<16x16xbf16>
    %cst_34 = arith.constant dense<0.000000e+00> : vector<16x16xf32>
    %78 = tpu.matmul %76, %77, %cst_34 {dimension_numbers = #tpu.dot_dimension_numbers<[1], [1], [0], [0], [0, 0, 1, 0], [], []>} : vector<16x16xbf16>, vector<16x16xbf16>, vector<16x16xf32> -> vector<16x16xf32>
    %cst_35 = arith.constant 2.500000e-01 : f32
    %79 = vector.broadcast %cst_35 : f32 to vector<16x16xf32>
    %80 = arith.mulf %78, %79 : vector<16x16xf32>
    %81 = arith.addf %80, %25 : vector<16x16xf32>
    %cst_36 = arith.constant dense<0xFF800000> : vector<16xf32>
    %82 = vector.multi_reduction <maximumf>, %81, %cst_36 [1] : vector<16x16xf32> to vector<16xf32>
    %83 = vector.shape_cast %82 : vector<16xf32> to vector<16x1xf32>
    %84 = vector.broadcast %83 : vector<16x1xf32> to vector<16x16xf32>
    %85 = arith.subf %81, %84 : vector<16x16xf32>
    %86 = math.exp %85 : vector<16x16xf32>
    %cst_37 = arith.constant dense<0.000000e+00> : vector<16xf32>
    %87 = vector.multi_reduction <add>, %86, %cst_37 [1] : vector<16x16xf32> to vector<16xf32>
    %88 = vector.shape_cast %87 : vector<16xf32> to vector<16x1xf32>
    %89 = tpu.reciprocal %88 {approx = true} : vector<16x1xf32> -> vector<16x1xf32>
    %90 = vector.broadcast %89 : vector<16x1xf32> to vector<16x16xf32>
    %91 = arith.mulf %86, %90 : vector<16x16xf32>
    %92 = arith.truncf %91 : vector<16x16xf32> to vector<16x16xbf16>
    %93 = arith.truncf %75 : vector<16x16xf32> to vector<16x16xbf16>
    %cst_38 = arith.constant dense<0.000000e+00> : vector<16x16xf32>
    %94 = tpu.matmul %92, %93, %cst_38 {dimension_numbers = #tpu.dot_dimension_numbers<[1], [0], [0], [1], [0, 0, 1, 1], [], []>} : vector<16x16xbf16>, vector<16x16xbf16>, vector<16x16xf32> -> vector<16x16xf32>
    %95 = tpu.concatenate %60, %94 in 1 : vector<16x16xf32>, vector<16x16xf32> -> vector<16x32xf32>
    %96 = arith.truncf %95 : vector<16x32xf32> to vector<16x32xbf16>
    %c192 = arith.constant 192 : index
    %c0_39 = arith.constant 0 : index
    %97 = vector.load %arg3[%c192, %c0_39] : memref<704x128xbf16, #tpu.memory_space<vmem>>, vector<32x32xbf16>
    %cst_40 = arith.constant dense<0.000000e+00> : vector<16x32xf32>
    %98 = tpu.matmul %96, %97, %cst_40 {dimension_numbers = #tpu.dot_dimension_numbers<[1], [0], [0], [1], [0, 0, 1, 1], [], []>} : vector<16x32xbf16>, vector<32x32xbf16>, vector<16x32xf32> -> vector<16x32xf32>
    %c8 = arith.constant 8 : index
    %c0_41 = arith.constant 0 : index
    %99 = vector.load %arg4[%c8, %c0_41] : memref<32x128xf32, #tpu.memory_space<vmem>>, vector<1x32xf32>
    %100 = vector.broadcast %99 : vector<1x32xf32> to vector<16x32xf32>
    %101 = arith.addf %98, %100 : vector<16x32xf32>
    %102 = arith.addf %101, %24 : vector<16x32xf32>
    %c9 = arith.constant 9 : index
    %c0_42 = arith.constant 0 : index
    %103 = vector.load %arg4[%c9, %c0_42] : memref<32x128xf32, #tpu.memory_space<vmem>>, vector<1x32xf32>
    %c10 = arith.constant 10 : index
    %c0_43 = arith.constant 0 : index
    %104 = vector.load %arg4[%c10, %c0_43] : memref<32x128xf32, #tpu.memory_space<vmem>>, vector<1x32xf32>
    %cst_44 = arith.constant dense<0.000000e+00> : vector<16xf32>
    %105 = vector.multi_reduction <add>, %102, %cst_44 [1] : vector<16x32xf32> to vector<16xf32>
    %106 = vector.shape_cast %105 : vector<16xf32> to vector<16x1xf32>
    %cst_45 = arith.constant 3.125000e-02 : f32
    %107 = vector.broadcast %cst_45 : f32 to vector<16x1xf32>
    %108 = arith.mulf %106, %107 : vector<16x1xf32>
    %109 = arith.mulf %102, %102 : vector<16x32xf32>
    %cst_46 = arith.constant dense<0.000000e+00> : vector<16xf32>
    %110 = vector.multi_reduction <add>, %109, %cst_46 [1] : vector<16x32xf32> to vector<16xf32>
    %111 = vector.shape_cast %110 : vector<16xf32> to vector<16x1xf32>
    %cst_47 = arith.constant 3.125000e-02 : f32
    %112 = vector.broadcast %cst_47 : f32 to vector<16x1xf32>
    %113 = arith.mulf %111, %112 : vector<16x1xf32>
    %114 = arith.mulf %108, %108 : vector<16x1xf32>
    %115 = arith.subf %113, %114 : vector<16x1xf32>
    %116 = vector.broadcast %108 : vector<16x1xf32> to vector<16x32xf32>
    %117 = arith.subf %102, %116 : vector<16x32xf32>
    %cst_48 = arith.constant 9.99999996E-13 : f32
    %118 = vector.broadcast %cst_48 : f32 to vector<16x1xf32>
    %119 = arith.addf %115, %118 : vector<16x1xf32>
    %120 = math.rsqrt %119 : vector<16x1xf32>
    %121 = vector.broadcast %120 : vector<16x1xf32> to vector<16x32xf32>
    %122 = arith.mulf %117, %121 : vector<16x32xf32>
    %123 = vector.broadcast %103 : vector<1x32xf32> to vector<16x32xf32>
    %124 = arith.mulf %122, %123 : vector<16x32xf32>
    %125 = vector.broadcast %104 : vector<1x32xf32> to vector<16x32xf32>
    %126 = arith.addf %124, %125 : vector<16x32xf32>
    %127 = arith.truncf %126 : vector<16x32xf32> to vector<16x32xbf16>
    %c224 = arith.constant 224 : index
    %c0_49 = arith.constant 0 : index
    %128 = vector.load %arg3[%c224, %c0_49] : memref<704x128xbf16, #tpu.memory_space<vmem>>, vector<32x64xbf16>
    %cst_50 = arith.constant dense<0.000000e+00> : vector<16x64xf32>
    %129 = tpu.matmul %127, %128, %cst_50 {dimension_numbers = #tpu.dot_dimension_numbers<[1], [0], [0], [1], [0, 0, 1, 1], [], []>} : vector<16x32xbf16>, vector<32x64xbf16>, vector<16x64xf32> -> vector<16x64xf32>
    %c11 = arith.constant 11 : index
    %c0_51 = arith.constant 0 : index
    %130 = vector.load %arg4[%c11, %c0_51] : memref<32x128xf32, #tpu.memory_space<vmem>>, vector<1x64xf32>
    %131 = vector.broadcast %130 : vector<1x64xf32> to vector<16x64xf32>
    %132 = arith.addf %129, %131 : vector<16x64xf32>
    %cst_52 = arith.constant 5.000000e-01 : f32
    %133 = vector.broadcast %cst_52 : f32 to vector<16x64xf32>
    %134 = arith.mulf %133, %132 : vector<16x64xf32>
    %cst_53 = arith.constant 4.471500e-02 : f32
    %135 = vector.broadcast %cst_53 : f32 to vector<16x64xf32>
    %136 = arith.mulf %135, %132 : vector<16x64xf32>
    %137 = arith.mulf %136, %132 : vector<16x64xf32>
    %138 = arith.mulf %137, %132 : vector<16x64xf32>
    %139 = arith.addf %132, %138 : vector<16x64xf32>
    %cst_54 = arith.constant 0.797884583 : f32
    %140 = vector.broadcast %cst_54 : f32 to vector<16x64xf32>
    %141 = arith.mulf %140, %139 : vector<16x64xf32>
    %142 = math.tanh %141 : vector<16x64xf32>
    %cst_55 = arith.constant 1.000000e+00 : f32
    %143 = vector.broadcast %cst_55 : f32 to vector<16x64xf32>
    %144 = arith.addf %143, %142 : vector<16x64xf32>
    %145 = arith.mulf %134, %144 : vector<16x64xf32>
    %146 = arith.truncf %145 : vector<16x64xf32> to vector<16x64xbf16>
    %c256 = arith.constant 256 : index
    %c0_56 = arith.constant 0 : index
    %147 = vector.load %arg3[%c256, %c0_56] : memref<704x128xbf16, #tpu.memory_space<vmem>>, vector<64x32xbf16>
    %cst_57 = arith.constant dense<0.000000e+00> : vector<16x32xf32>
    %148 = tpu.matmul %146, %147, %cst_57 {dimension_numbers = #tpu.dot_dimension_numbers<[1], [0], [0], [1], [0, 0, 1, 1], [], []>} : vector<16x64xbf16>, vector<64x32xbf16>, vector<16x32xf32> -> vector<16x32xf32>
    %c12 = arith.constant 12 : index
    %c0_58 = arith.constant 0 : index
    %149 = vector.load %arg4[%c12, %c0_58] : memref<32x128xf32, #tpu.memory_space<vmem>>, vector<1x32xf32>
    %150 = vector.broadcast %149 : vector<1x32xf32> to vector<16x32xf32>
    %151 = arith.addf %148, %150 : vector<16x32xf32>
    %152 = arith.addf %151, %126 : vector<16x32xf32>
    %c13 = arith.constant 13 : index
    %c0_59 = arith.constant 0 : index
    %153 = vector.load %arg4[%c13, %c0_59] : memref<32x128xf32, #tpu.memory_space<vmem>>, vector<1x32xf32>
    %c14 = arith.constant 14 : index
    %c0_60 = arith.constant 0 : index
    %154 = vector.load %arg4[%c14, %c0_60] : memref<32x128xf32, #tpu.memory_space<vmem>>, vector<1x32xf32>
    %cst_61 = arith.constant dense<0.000000e+00> : vector<16xf32>
    %155 = vector.multi_reduction <add>, %152, %cst_61 [1] : vector<16x32xf32> to vector<16xf32>
    %156 = vector.shape_cast %155 : vector<16xf32> to vector<16x1xf32>
    %cst_62 = arith.constant 3.125000e-02 : f32
    %157 = vector.broadcast %cst_62 : f32 to vector<16x1xf32>
    %158 = arith.mulf %156, %157 : vector<16x1xf32>
    %159 = arith.mulf %152, %152 : vector<16x32xf32>
    %cst_63 = arith.constant dense<0.000000e+00> : vector<16xf32>
    %160 = vector.multi_reduction <add>, %159, %cst_63 [1] : vector<16x32xf32> to vector<16xf32>
    %161 = vector.shape_cast %160 : vector<16xf32> to vector<16x1xf32>
    %cst_64 = arith.constant 3.125000e-02 : f32
    %162 = vector.broadcast %cst_64 : f32 to vector<16x1xf32>
    %163 = arith.mulf %161, %162 : vector<16x1xf32>
    %164 = arith.mulf %158, %158 : vector<16x1xf32>
    %165 = arith.subf %163, %164 : vector<16x1xf32>
    %166 = vector.broadcast %158 : vector<16x1xf32> to vector<16x32xf32>
    %167 = arith.subf %152, %166 : vector<16x32xf32>
    %cst_65 = arith.constant 9.99999996E-13 : f32
    %168 = vector.broadcast %cst_65 : f32 to vector<16x1xf32>
    %169 = arith.addf %165, %168 : vector<16x1xf32>
    %170 = math.rsqrt %169 : vector<16x1xf32>
    %171 = vector.broadcast %170 : vector<16x1xf32> to vector<16x32xf32>
    %172 = arith.mulf %167, %171 : vector<16x32xf32>
    %173 = vector.broadcast %153 : vector<1x32xf32> to vector<16x32xf32>
    %174 = arith.mulf %172, %173 : vector<16x32xf32>
    %175 = vector.broadcast %154 : vector<1x32xf32> to vector<16x32xf32>
    %176 = arith.addf %174, %175 : vector<16x32xf32>
    %177 = arith.truncf %176 : vector<16x32xf32> to vector<16x32xbf16>
    %c320 = arith.constant 320 : index
    %c0_66 = arith.constant 0 : index
    %178 = vector.load %arg3[%c320, %c0_66] : memref<704x128xbf16, #tpu.memory_space<vmem>>, vector<32x16xbf16>
    %cst_67 = arith.constant dense<0.000000e+00> : vector<16x16xf32>
    %179 = tpu.matmul %177, %178, %cst_67 {dimension_numbers = #tpu.dot_dimension_numbers<[1], [0], [0], [1], [0, 0, 1, 1], [], []>} : vector<16x32xbf16>, vector<32x16xbf16>, vector<16x16xf32> -> vector<16x16xf32>
    %c15 = arith.constant 15 : index
    %c0_68 = arith.constant 0 : index
    %180 = vector.load %arg4[%c15, %c0_68] : memref<32x128xf32, #tpu.memory_space<vmem>>, vector<1x16xf32>
    %181 = vector.broadcast %180 : vector<1x16xf32> to vector<16x16xf32>
    %182 = arith.addf %179, %181 : vector<16x16xf32>
    %c352 = arith.constant 352 : index
    %c0_69 = arith.constant 0 : index
    %183 = vector.load %arg3[%c352, %c0_69] : memref<704x128xbf16, #tpu.memory_space<vmem>>, vector<32x16xbf16>
    %cst_70 = arith.constant dense<0.000000e+00> : vector<16x16xf32>
    %184 = tpu.matmul %177, %183, %cst_70 {dimension_numbers = #tpu.dot_dimension_numbers<[1], [0], [0], [1], [0, 0, 1, 1], [], []>} : vector<16x32xbf16>, vector<32x16xbf16>, vector<16x16xf32> -> vector<16x16xf32>
    %c16 = arith.constant 16 : index
    %c0_71 = arith.constant 0 : index
    %185 = vector.load %arg4[%c16, %c0_71] : memref<32x128xf32, #tpu.memory_space<vmem>>, vector<1x16xf32>
    %186 = vector.broadcast %185 : vector<1x16xf32> to vector<16x16xf32>
    %187 = arith.addf %184, %186 : vector<16x16xf32>
    %c384 = arith.constant 384 : index
    %c0_72 = arith.constant 0 : index
    %188 = vector.load %arg3[%c384, %c0_72] : memref<704x128xbf16, #tpu.memory_space<vmem>>, vector<32x16xbf16>
    %cst_73 = arith.constant dense<0.000000e+00> : vector<16x16xf32>
    %189 = tpu.matmul %177, %188, %cst_73 {dimension_numbers = #tpu.dot_dimension_numbers<[1], [0], [0], [1], [0, 0, 1, 1], [], []>} : vector<16x32xbf16>, vector<32x16xbf16>, vector<16x16xf32> -> vector<16x16xf32>
    %c17 = arith.constant 17 : index
    %c0_74 = arith.constant 0 : index
    %190 = vector.load %arg4[%c17, %c0_74] : memref<32x128xf32, #tpu.memory_space<vmem>>, vector<1x16xf32>
    %191 = vector.broadcast %190 : vector<1x16xf32> to vector<16x16xf32>
    %192 = arith.addf %189, %191 : vector<16x16xf32>
    %193 = arith.truncf %182 : vector<16x16xf32> to vector<16x16xbf16>
    %194 = arith.truncf %187 : vector<16x16xf32> to vector<16x16xbf16>
    %cst_75 = arith.constant dense<0.000000e+00> : vector<16x16xf32>
    %195 = tpu.matmul %193, %194, %cst_75 {dimension_numbers = #tpu.dot_dimension_numbers<[1], [1], [0], [0], [0, 0, 1, 0], [], []>} : vector<16x16xbf16>, vector<16x16xbf16>, vector<16x16xf32> -> vector<16x16xf32>
    %cst_76 = arith.constant 2.500000e-01 : f32
    %196 = vector.broadcast %cst_76 : f32 to vector<16x16xf32>
    %197 = arith.mulf %195, %196 : vector<16x16xf32>
    %198 = arith.addf %197, %25 : vector<16x16xf32>
    %cst_77 = arith.constant dense<0xFF800000> : vector<16xf32>
    %199 = vector.multi_reduction <maximumf>, %198, %cst_77 [1] : vector<16x16xf32> to vector<16xf32>
    %200 = vector.shape_cast %199 : vector<16xf32> to vector<16x1xf32>
    %201 = vector.broadcast %200 : vector<16x1xf32> to vector<16x16xf32>
    %202 = arith.subf %198, %201 : vector<16x16xf32>
    %203 = math.exp %202 : vector<16x16xf32>
    %cst_78 = arith.constant dense<0.000000e+00> : vector<16xf32>
    %204 = vector.multi_reduction <add>, %203, %cst_78 [1] : vector<16x16xf32> to vector<16xf32>
    %205 = vector.shape_cast %204 : vector<16xf32> to vector<16x1xf32>
    %206 = tpu.reciprocal %205 {approx = true} : vector<16x1xf32> -> vector<16x1xf32>
    %207 = vector.broadcast %206 : vector<16x1xf32> to vector<16x16xf32>
    %208 = arith.mulf %203, %207 : vector<16x16xf32>
    %209 = arith.truncf %208 : vector<16x16xf32> to vector<16x16xbf16>
    %210 = arith.truncf %192 : vector<16x16xf32> to vector<16x16xbf16>
    %cst_79 = arith.constant dense<0.000000e+00> : vector<16x16xf32>
    %211 = tpu.matmul %209, %210, %cst_79 {dimension_numbers = #tpu.dot_dimension_numbers<[1], [0], [0], [1], [0, 0, 1, 1], [], []>} : vector<16x16xbf16>, vector<16x16xbf16>, vector<16x16xf32> -> vector<16x16xf32>
    %c416 = arith.constant 416 : index
    %c0_80 = arith.constant 0 : index
    %212 = vector.load %arg3[%c416, %c0_80] : memref<704x128xbf16, #tpu.memory_space<vmem>>, vector<32x16xbf16>
    %cst_81 = arith.constant dense<0.000000e+00> : vector<16x16xf32>
    %213 = tpu.matmul %177, %212, %cst_81 {dimension_numbers = #tpu.dot_dimension_numbers<[1], [0], [0], [1], [0, 0, 1, 1], [], []>} : vector<16x32xbf16>, vector<32x16xbf16>, vector<16x16xf32> -> vector<16x16xf32>
    %c18 = arith.constant 18 : index
    %c0_82 = arith.constant 0 : index
    %214 = vector.load %arg4[%c18, %c0_82] : memref<32x128xf32, #tpu.memory_space<vmem>>, vector<1x16xf32>
    %215 = vector.broadcast %214 : vector<1x16xf32> to vector<16x16xf32>
    %216 = arith.addf %213, %215 : vector<16x16xf32>
    %c448 = arith.constant 448 : index
    %c0_83 = arith.constant 0 : index
    %217 = vector.load %arg3[%c448, %c0_83] : memref<704x128xbf16, #tpu.memory_space<vmem>>, vector<32x16xbf16>
    %cst_84 = arith.constant dense<0.000000e+00> : vector<16x16xf32>
    %218 = tpu.matmul %177, %217, %cst_84 {dimension_numbers = #tpu.dot_dimension_numbers<[1], [0], [0], [1], [0, 0, 1, 1], [], []>} : vector<16x32xbf16>, vector<32x16xbf16>, vector<16x16xf32> -> vector<16x16xf32>
    %c19 = arith.constant 19 : index
    %c0_85 = arith.constant 0 : index
    %219 = vector.load %arg4[%c19, %c0_85] : memref<32x128xf32, #tpu.memory_space<vmem>>, vector<1x16xf32>
    %220 = vector.broadcast %219 : vector<1x16xf32> to vector<16x16xf32>
    %221 = arith.addf %218, %220 : vector<16x16xf32>
    %c480 = arith.constant 480 : index
    %c0_86 = arith.constant 0 : index
    %222 = vector.load %arg3[%c480, %c0_86] : memref<704x128xbf16, #tpu.memory_space<vmem>>, vector<32x16xbf16>
    %cst_87 = arith.constant dense<0.000000e+00> : vector<16x16xf32>
    %223 = tpu.matmul %177, %222, %cst_87 {dimension_numbers = #tpu.dot_dimension_numbers<[1], [0], [0], [1], [0, 0, 1, 1], [], []>} : vector<16x32xbf16>, vector<32x16xbf16>, vector<16x16xf32> -> vector<16x16xf32>
    %c20 = arith.constant 20 : index
    %c0_88 = arith.constant 0 : index
    %224 = vector.load %arg4[%c20, %c0_88] : memref<32x128xf32, #tpu.memory_space<vmem>>, vector<1x16xf32>
    %225 = vector.broadcast %224 : vector<1x16xf32> to vector<16x16xf32>
    %226 = arith.addf %223, %225 : vector<16x16xf32>
    %227 = arith.truncf %216 : vector<16x16xf32> to vector<16x16xbf16>
    %228 = arith.truncf %221 : vector<16x16xf32> to vector<16x16xbf16>
    %cst_89 = arith.constant dense<0.000000e+00> : vector<16x16xf32>
    %229 = tpu.matmul %227, %228, %cst_89 {dimension_numbers = #tpu.dot_dimension_numbers<[1], [1], [0], [0], [0, 0, 1, 0], [], []>} : vector<16x16xbf16>, vector<16x16xbf16>, vector<16x16xf32> -> vector<16x16xf32>
    %cst_90 = arith.constant 2.500000e-01 : f32
    %230 = vector.broadcast %cst_90 : f32 to vector<16x16xf32>
    %231 = arith.mulf %229, %230 : vector<16x16xf32>
    %232 = arith.addf %231, %25 : vector<16x16xf32>
    %cst_91 = arith.constant dense<0xFF800000> : vector<16xf32>
    %233 = vector.multi_reduction <maximumf>, %232, %cst_91 [1] : vector<16x16xf32> to vector<16xf32>
    %234 = vector.shape_cast %233 : vector<16xf32> to vector<16x1xf32>
    %235 = vector.broadcast %234 : vector<16x1xf32> to vector<16x16xf32>
    %236 = arith.subf %232, %235 : vector<16x16xf32>
    %237 = math.exp %236 : vector<16x16xf32>
    %cst_92 = arith.constant dense<0.000000e+00> : vector<16xf32>
    %238 = vector.multi_reduction <add>, %237, %cst_92 [1] : vector<16x16xf32> to vector<16xf32>
    %239 = vector.shape_cast %238 : vector<16xf32> to vector<16x1xf32>
    %240 = tpu.reciprocal %239 {approx = true} : vector<16x1xf32> -> vector<16x1xf32>
    %241 = vector.broadcast %240 : vector<16x1xf32> to vector<16x16xf32>
    %242 = arith.mulf %237, %241 : vector<16x16xf32>
    %243 = arith.truncf %242 : vector<16x16xf32> to vector<16x16xbf16>
    %244 = arith.truncf %226 : vector<16x16xf32> to vector<16x16xbf16>
    %cst_93 = arith.constant dense<0.000000e+00> : vector<16x16xf32>
    %245 = tpu.matmul %243, %244, %cst_93 {dimension_numbers = #tpu.dot_dimension_numbers<[1], [0], [0], [1], [0, 0, 1, 1], [], []>} : vector<16x16xbf16>, vector<16x16xbf16>, vector<16x16xf32> -> vector<16x16xf32>
    %246 = tpu.concatenate %211, %245 in 1 : vector<16x16xf32>, vector<16x16xf32> -> vector<16x32xf32>
    %247 = arith.truncf %246 : vector<16x32xf32> to vector<16x32xbf16>
    %c512 = arith.constant 512 : index
    %c0_94 = arith.constant 0 : index
    %248 = vector.load %arg3[%c512, %c0_94] : memref<704x128xbf16, #tpu.memory_space<vmem>>, vector<32x32xbf16>
    %cst_95 = arith.constant dense<0.000000e+00> : vector<16x32xf32>
    %249 = tpu.matmul %247, %248, %cst_95 {dimension_numbers = #tpu.dot_dimension_numbers<[1], [0], [0], [1], [0, 0, 1, 1], [], []>} : vector<16x32xbf16>, vector<32x32xbf16>, vector<16x32xf32> -> vector<16x32xf32>
    %c21 = arith.constant 21 : index
    %c0_96 = arith.constant 0 : index
    %250 = vector.load %arg4[%c21, %c0_96] : memref<32x128xf32, #tpu.memory_space<vmem>>, vector<1x32xf32>
    %251 = vector.broadcast %250 : vector<1x32xf32> to vector<16x32xf32>
    %252 = arith.addf %249, %251 : vector<16x32xf32>
    %253 = arith.addf %252, %176 : vector<16x32xf32>
    %c22 = arith.constant 22 : index
    %c0_97 = arith.constant 0 : index
    %254 = vector.load %arg4[%c22, %c0_97] : memref<32x128xf32, #tpu.memory_space<vmem>>, vector<1x32xf32>
    %c23 = arith.constant 23 : index
    %c0_98 = arith.constant 0 : index
    %255 = vector.load %arg4[%c23, %c0_98] : memref<32x128xf32, #tpu.memory_space<vmem>>, vector<1x32xf32>
    %cst_99 = arith.constant dense<0.000000e+00> : vector<16xf32>
    %256 = vector.multi_reduction <add>, %253, %cst_99 [1] : vector<16x32xf32> to vector<16xf32>
    %257 = vector.shape_cast %256 : vector<16xf32> to vector<16x1xf32>
    %cst_100 = arith.constant 3.125000e-02 : f32
    %258 = vector.broadcast %cst_100 : f32 to vector<16x1xf32>
    %259 = arith.mulf %257, %258 : vector<16x1xf32>
    %260 = arith.mulf %253, %253 : vector<16x32xf32>
    %cst_101 = arith.constant dense<0.000000e+00> : vector<16xf32>
    %261 = vector.multi_reduction <add>, %260, %cst_101 [1] : vector<16x32xf32> to vector<16xf32>
    %262 = vector.shape_cast %261 : vector<16xf32> to vector<16x1xf32>
    %cst_102 = arith.constant 3.125000e-02 : f32
    %263 = vector.broadcast %cst_102 : f32 to vector<16x1xf32>
    %264 = arith.mulf %262, %263 : vector<16x1xf32>
    %265 = arith.mulf %259, %259 : vector<16x1xf32>
    %266 = arith.subf %264, %265 : vector<16x1xf32>
    %267 = vector.broadcast %259 : vector<16x1xf32> to vector<16x32xf32>
    %268 = arith.subf %253, %267 : vector<16x32xf32>
    %cst_103 = arith.constant 9.99999996E-13 : f32
    %269 = vector.broadcast %cst_103 : f32 to vector<16x1xf32>
    %270 = arith.addf %266, %269 : vector<16x1xf32>
    %271 = math.rsqrt %270 : vector<16x1xf32>
    %272 = vector.broadcast %271 : vector<16x1xf32> to vector<16x32xf32>
    %273 = arith.mulf %268, %272 : vector<16x32xf32>
    %274 = vector.broadcast %254 : vector<1x32xf32> to vector<16x32xf32>
    %275 = arith.mulf %273, %274 : vector<16x32xf32>
    %276 = vector.broadcast %255 : vector<1x32xf32> to vector<16x32xf32>
    %277 = arith.addf %275, %276 : vector<16x32xf32>
    %278 = arith.truncf %277 : vector<16x32xf32> to vector<16x32xbf16>
    %c544 = arith.constant 544 : index
    %c0_104 = arith.constant 0 : index
    %279 = vector.load %arg3[%c544, %c0_104] : memref<704x128xbf16, #tpu.memory_space<vmem>>, vector<32x64xbf16>
    %cst_105 = arith.constant dense<0.000000e+00> : vector<16x64xf32>
    %280 = tpu.matmul %278, %279, %cst_105 {dimension_numbers = #tpu.dot_dimension_numbers<[1], [0], [0], [1], [0, 0, 1, 1], [], []>} : vector<16x32xbf16>, vector<32x64xbf16>, vector<16x64xf32> -> vector<16x64xf32>
    %c24 = arith.constant 24 : index
    %c0_106 = arith.constant 0 : index
    %281 = vector.load %arg4[%c24, %c0_106] : memref<32x128xf32, #tpu.memory_space<vmem>>, vector<1x64xf32>
    %282 = vector.broadcast %281 : vector<1x64xf32> to vector<16x64xf32>
    %283 = arith.addf %280, %282 : vector<16x64xf32>
    %cst_107 = arith.constant 5.000000e-01 : f32
    %284 = vector.broadcast %cst_107 : f32 to vector<16x64xf32>
    %285 = arith.mulf %284, %283 : vector<16x64xf32>
    %cst_108 = arith.constant 4.471500e-02 : f32
    %286 = vector.broadcast %cst_108 : f32 to vector<16x64xf32>
    %287 = arith.mulf %286, %283 : vector<16x64xf32>
    %288 = arith.mulf %287, %283 : vector<16x64xf32>
    %289 = arith.mulf %288, %283 : vector<16x64xf32>
    %290 = arith.addf %283, %289 : vector<16x64xf32>
    %cst_109 = arith.constant 0.797884583 : f32
    %291 = vector.broadcast %cst_109 : f32 to vector<16x64xf32>
    %292 = arith.mulf %291, %290 : vector<16x64xf32>
    %293 = math.tanh %292 : vector<16x64xf32>
    %cst_110 = arith.constant 1.000000e+00 : f32
    %294 = vector.broadcast %cst_110 : f32 to vector<16x64xf32>
    %295 = arith.addf %294, %293 : vector<16x64xf32>
    %296 = arith.mulf %285, %295 : vector<16x64xf32>
    %297 = arith.truncf %296 : vector<16x64xf32> to vector<16x64xbf16>
    %c576 = arith.constant 576 : index
    %c0_111 = arith.constant 0 : index
    %298 = vector.load %arg3[%c576, %c0_111] : memref<704x128xbf16, #tpu.memory_space<vmem>>, vector<64x32xbf16>
    %cst_112 = arith.constant dense<0.000000e+00> : vector<16x32xf32>
    %299 = tpu.matmul %297, %298, %cst_112 {dimension_numbers = #tpu.dot_dimension_numbers<[1], [0], [0], [1], [0, 0, 1, 1], [], []>} : vector<16x64xbf16>, vector<64x32xbf16>, vector<16x32xf32> -> vector<16x32xf32>
    %c25 = arith.constant 25 : index
    %c0_113 = arith.constant 0 : index
    %300 = vector.load %arg4[%c25, %c0_113] : memref<32x128xf32, #tpu.memory_space<vmem>>, vector<1x32xf32>
    %301 = vector.broadcast %300 : vector<1x32xf32> to vector<16x32xf32>
    %302 = arith.addf %299, %301 : vector<16x32xf32>
    %303 = arith.addf %302, %277 : vector<16x32xf32>
    %c26 = arith.constant 26 : index
    %c0_114 = arith.constant 0 : index
    %304 = vector.load %arg4[%c26, %c0_114] : memref<32x128xf32, #tpu.memory_space<vmem>>, vector<1x32xf32>
    %c27 = arith.constant 27 : index
    %c0_115 = arith.constant 0 : index
    %305 = vector.load %arg4[%c27, %c0_115] : memref<32x128xf32, #tpu.memory_space<vmem>>, vector<1x32xf32>
    %cst_116 = arith.constant dense<0.000000e+00> : vector<16xf32>
    %306 = vector.multi_reduction <add>, %303, %cst_116 [1] : vector<16x32xf32> to vector<16xf32>
    %307 = vector.shape_cast %306 : vector<16xf32> to vector<16x1xf32>
    %cst_117 = arith.constant 3.125000e-02 : f32
    %308 = vector.broadcast %cst_117 : f32 to vector<16x1xf32>
    %309 = arith.mulf %307, %308 : vector<16x1xf32>
    %310 = arith.mulf %303, %303 : vector<16x32xf32>
    %cst_118 = arith.constant dense<0.000000e+00> : vector<16xf32>
    %311 = vector.multi_reduction <add>, %310, %cst_118 [1] : vector<16x32xf32> to vector<16xf32>
    %312 = vector.shape_cast %311 : vector<16xf32> to vector<16x1xf32>
    %cst_119 = arith.constant 3.125000e-02 : f32
    %313 = vector.broadcast %cst_119 : f32 to vector<16x1xf32>
    %314 = arith.mulf %312, %313 : vector<16x1xf32>
    %315 = arith.mulf %309, %309 : vector<16x1xf32>
    %316 = arith.subf %314, %315 : vector<16x1xf32>
    %317 = vector.broadcast %309 : vector<16x1xf32> to vector<16x32xf32>
    %318 = arith.subf %303, %317 : vector<16x32xf32>
    %cst_120 = arith.constant 9.99999996E-13 : f32
    %319 = vector.broadcast %cst_120 : f32 to vector<16x1xf32>
    %320 = arith.addf %316, %319 : vector<16x1xf32>
    %321 = math.rsqrt %320 : vector<16x1xf32>
    %322 = vector.broadcast %321 : vector<16x1xf32> to vector<16x32xf32>
    %323 = arith.mulf %318, %322 : vector<16x32xf32>
    %324 = vector.broadcast %304 : vector<1x32xf32> to vector<16x32xf32>
    %325 = arith.mulf %323, %324 : vector<16x32xf32>
    %326 = vector.broadcast %305 : vector<1x32xf32> to vector<16x32xf32>
    %327 = arith.addf %325, %326 : vector<16x32xf32>
    %328 = arith.truncf %327 : vector<16x32xf32> to vector<16x32xbf16>
    %c640 = arith.constant 640 : index
    %c0_121 = arith.constant 0 : index
    %329 = vector.load %arg3[%c640, %c0_121] : memref<704x128xbf16, #tpu.memory_space<vmem>>, vector<32x32xbf16>
    %cst_122 = arith.constant dense<0.000000e+00> : vector<16x32xf32>
    %330 = tpu.matmul %328, %329, %cst_122 {dimension_numbers = #tpu.dot_dimension_numbers<[1], [0], [0], [1], [0, 0, 1, 1], [], []>} : vector<16x32xbf16>, vector<32x32xbf16>, vector<16x32xf32> -> vector<16x32xf32>
    %c28 = arith.constant 28 : index
    %c0_123 = arith.constant 0 : index
    %331 = vector.load %arg4[%c28, %c0_123] : memref<32x128xf32, #tpu.memory_space<vmem>>, vector<1x32xf32>
    %332 = vector.broadcast %331 : vector<1x32xf32> to vector<16x32xf32>
    %333 = arith.addf %330, %332 : vector<16x32xf32>
    %334 = math.tanh %333 : vector<16x32xf32>
    %335 = arith.truncf %334 : vector<16x32xf32> to vector<16x32xbf16>
    %c672 = arith.constant 672 : index
    %c0_124 = arith.constant 0 : index
    %336 = vector.load %arg3[%c672, %c0_124] : memref<704x128xbf16, #tpu.memory_space<vmem>>, vector<32x128xbf16>
    %cst_125 = arith.constant dense<0.000000e+00> : vector<16x128xf32>
    %337 = tpu.matmul %335, %336, %cst_125 {dimension_numbers = #tpu.dot_dimension_numbers<[1], [0], [0], [1], [0, 0, 1, 1], [], []>} : vector<16x32xbf16>, vector<32x128xbf16>, vector<16x128xf32> -> vector<16x128xf32>
    %c29 = arith.constant 29 : index
    %c0_126 = arith.constant 0 : index
    %338 = vector.load %arg4[%c29, %c0_126] : memref<32x128xf32, #tpu.memory_space<vmem>>, vector<1x128xf32>
    %339 = vector.broadcast %338 : vector<1x128xf32> to vector<16x128xf32>
    %340 = arith.addf %337, %339 : vector<16x128xf32>
    %c0_127 = arith.constant 0 : index
    %c0_128 = arith.constant 0 : index
    %341 = vector.load %arg5[%c0_127, %c0_128] : memref<16x128xf32, #tpu.memory_space<vmem>>, vector<16x128xf32>
    tpu.vector_store %arg5[%c0_127, %c0_128], %340 {strides = array<i32>} : memref<16x128xf32, #tpu.memory_space<vmem>>, vector<16x128xf32>,
    return
  }
  func.func @transform_0(%arg0: i32) -> (i32, i32) {
    %c0_i32 = arith.constant 0 : i32
    %c0_i32_0 = arith.constant 0 : i32
    %c0_i32_1 = arith.constant 0 : i32
    return %c0_i32, %c0_i32_0 : i32, i32
  }
  func.func @transform_1(%arg0: i32) -> (i32, i32) {
    %c0_i32 = arith.constant 0 : i32
    %c0_i32_0 = arith.constant 0 : i32
    %c0_i32_1 = arith.constant 0 : i32
    return %c0_i32, %c0_i32_0 : i32, i32
  }
  func.func @transform_2(%arg0: i32) -> (i32, i32) {
    %c0_i32 = arith.constant 0 : i32
    %c0_i32_0 = arith.constant 0 : i32
    %c0_i32_1 = arith.constant 0 : i32
    return %c0_i32, %c0_i32_0 : i32, i32
  }
  func.func @transform_3(%arg0: i32) -> (i32, i32) {
    %c0_i32 = arith.constant 0 : i32
    %c0_i32_0 = arith.constant 0 : i32
    %c0_i32_1 = arith.constant 0 : i32
    return %c0_i32, %c0_i32_0 : i32, i32
  }
  func.func @transform_4(%arg0: i32) -> (i32, i32) {
    %c0_i32 = arith.constant 0 : i32
    %c0_i32_0 = arith.constant 0 : i32
    %c0_i32_1 = arith.constant 0 : i32
    return %c0_i32, %c0_i32_0 : i32, i32
  }
}

</mosaic_0001>

<bundles_post_ra>
// kernel: nli_forward.1
= control target key start
LH: loop header
LB: loop body
LE: loop exit
PB: predicated region body
PF: predicated region fallthrough
CT: control target
= control target key end

     0   :  { %vm22_vm0 = vcmask 261120   ;;  %v2632_v9 = vmov 0.0   ;;  %vm2633_vm1 = vmmov 0   ;;  %vm259_vm2 = vcmask 130048   ;;  %s2634_s12 = smov 16   ;;  %s3144_s0 = inlined_call_operand.vmem [shape: f32[16,32], index: 0, kind: input, shape index: {}]   ;;  %s3145_s2 = inlined_call_operand.vmem [shape: bf16[704,128], index: 2, kind: input, shape index: {}]   ;;  %s3146_s3 = inlined_call_operand.vmem [shape: f32[32,128], index: 3, kind: input, shape index: {}]   ;;  %s3147_s1 = inlined_call_operand.vmem [shape: f32[16,16], index: 1, kind: input, shape index: {}]   ;;  %s3148_s4 = inlined_call_operand.vmem [shape: f32[16,128], index: 4, kind: output, shape index: {}]  }
   0x1   :  { %v18_v0 = vld [vmem:[%s3144_s0] sm:$0xff]  ;;  %v19_v1 = vld [vmem:[%s3144_s0 + $0x8] sm:$0xff]  ;;  %2295 = vmatprep.subr.bf16.mxu0 %v2632_v9  ;;  %2303 = vmatprep.subr.bf16.mxu1 %v2632_v9  ;;  %v2525_v10 = vld [vmem:[%s3145_s2 + $0x10] sm:$0xff]   ;;  %vm930_vm3 = vcmask 523264  }
   0x2   :  { %v23_v2 = vsel %vm22_vm0, %v18_v0, 0.0  ;;  %v31_v3 = vmul.f32 %v18_v0, %v18_v0  ;;  %v32_v4 = vmul.f32 %v19_v1, %v19_v1  ;;  %v26_v6 = vsel %vm22_vm0, %v19_v1, 0.0  ;;  %v2524_v8 = vld [vmem:[%s3145_s2] sm:$0xff]   ;;  %2304 = vmatpush3.bf16.msra.mxu1 %v2525_v10  ;;  %v2526_v11 = vld [vmem:[%s3145_s2 + $0x8] sm:$0xff]   ;;  %v2527_v12 = vld [vmem:[%s3145_s2 + $0x18] sm:$0xff]   ;;  %2299 = vmatprep.mubr.msk.bf16.mxu0 %vm2633_vm1, %v2632_v9 }
   0x3   :  { %24 = vadd.xlane.f32.xlu0 %v23_v2  ;;  %2296 = vmatpush3.bf16.msra.mxu0 %v2524_v8  ;;  %v2113_v30 = vld [vmem:[%s3146_s3] ss:$0 sm:$0xff]  ;;  %v2114_v35 = vld [vmem:[%s3146_s3 + $0x1] ss:$0 sm:$0xff]  ;;  %v2529_v41 = vld [vmem:[%s3145_s2 + $0x28] sm:$0xff]  }
   0x4   :  { %v33_v5 = vsel %vm22_vm0, %v31_v3, 0.0  ;;  %v36_v7 = vsel %vm22_vm0, %v32_v4, 0.0  ;;  %2297 = vmatprep.subr.bf16.mxu0 %v2632_v9  ;;  %2305 = vmatprep.subr.bf16.mxu1 %v2632_v9  ;;  %v2528_v39 = vld [vmem:[%s3145_s2 + $0x20] sm:$0xff]   ;;  %v2530_v2 = vld [vmem:[%s3145_s2 + $0x30] sm:$0xff]   ;;  %v2531_v4 = vld [vmem:[%s3145_s2 + $0x38] sm:$0xff]  }
   0x5   :  { %34 = vadd.xlane.f32.xlu1 %v33_v5  ;;  %2307 = vmatprep.mubr.msk.bf16.mxu1 %vm2633_vm1, %v2632_v9  ;;  %v2115_v42 = vld [vmem:[%s3146_s3 + $0x2] ss:$0 sm:$0xff]  ;;  %v2119_v44 = vld [vmem:[%s3146_s3 + $0x3] ss:$0 sm:$0xff]  ;;  %v2123_v59 = vld [vmem:[%s3146_s3 + $0x4] ss:$0 sm:$0xff] }
   0x6   :  { %2306 = vmatpush3.bf16.msra.mxu1 %v2527_v12  ;;  %v2532_v5 = vld [vmem:[%s3145_s2 + $0x50] sm:$0xff]   ;;  %v2768_v8 = vld [vmem:[%s3147_s1] sm:$0xff] }
   0x7   :  { %27 = vadd.xlane.f32.xlu0 %v26_v6  ;;  %2298 = vmatpush3.bf16.msra.mxu0 %v2526_v11  ;;  %v2533_v6 = vld [vmem:[%s3145_s2 + $0x58] sm:$0xff]  }
   0x8   :  { %2311 = vmatprep.subr.bf16.mxu0 %v2632_v9  ;;  %2319 = vmatprep.subr.bf16.mxu1 %v2632_v9 }
   0x9   :  { %37 = vadd.xlane.f32.xlu1 %v36_v7 }
  0x90   :  { %v25_v13 = vpop.xlane.xlu0 %24 }
  0x91   :  { %v29_v14 = vmul.f32 0.03125, %v25_v13  ;;  %v2773_v13 = vld [vmem:[%s3147_s1 + $0x8] sm:$0xff] }
  0x92   :  { %v35_v15 = vpop.xlane.xlu1 %34 }
  0x93   :  { %v41_v16 = vmul.f32 %v29_v14, %v29_v14  ;;  %v39_v17 = vmul.f32 0.03125, %v35_v15  ;;  %v45_v27 = vsub.f32 %v18_v0, %v29_v14 }
  0x94   :  { %v28_v18 = vpop.xlane.xlu0 %27 }
  0x95   :  { %v43_v19 = vsub.f32 %v39_v17, %v41_v16  ;;  %v30_v20 = vmul.f32 0.03125, %v28_v18 }
  0x96   :  { %v38_v21 = vpop.xlane.xlu1 %37 }
  0x97   :  { %v47_v22 = vadd.f32 1e-12, %v43_v19  ;;  %v42_v23 = vmul.f32 %v30_v20, %v30_v20  ;;  %v40_v24 = vmul.f32 0.03125, %v38_v21  ;;  %v46_v31 = vsub.f32 %v19_v1, %v30_v20  ;;  %v2129_v20 = vld [vmem:[%s3146_s3 + $0x5] ss:$0 sm:$0xff] }
  0x99   :  { %2568 = vrsqrt.f32 %v47_v22  ;;  %v44_v25 = vsub.f32 %v40_v24, %v42_v23 }
  0x9b   :  { %v48_v26 = vadd.f32 1e-12, %v44_v25 }
  0x9d   :  { %2570 = vrsqrt.f32 %v48_v26 }
  0xa3   :  { %v2569_v28 = vpop.eup %2568 }
  0xa4   :  { %v51_v29 = vmul.f32 %v2569_v28, %v45_v27  ;;  %v2137_v28 = vld [vmem:[%s3146_s3 + $0x7] ss:$0 sm:$0xff] }
  0xa6   :  { %v57_v33 = vmul.f32 %v2113_v30, %v51_v29 }
  0xa7   :  { %v2571_v32 = vpop.eup %2570 }
  0xa8   :  { %v52_v34 = vmul.f32 %v2571_v32, %v46_v31  ;;  %v2698_v37 = vadd.f32 %v2114_v35, %v57_v33 }
  0xaa   :  { %v58_v36 = vmul.f32 %v2113_v30, %v52_v34 }
  0xac   :  { %v2700_v38 = vadd.f32 %v2114_v35, %v58_v36 }
  0xae   :  { %v2707_v40 = vpack.c.bf16 %v2700_v38, %v2698_v37 }
  0xb0   :  { %2300 = vmatmul.mubr.msk.bf16.vlgmr.msra.gmra.mrb[0].mxu0 %vm22_vm0, %v2707_v40  ;;  %2308 = vmatmul.mubr.msk.bf16.vlgmr.msra.gmra.mrb[0].mxu1 %vm22_vm0, %v2707_v40 }
  0xb1   :  { %2312 = vmatpush3.bf16.msra.mxu0 %v2528_v39  ;;  %2315 = vmatprep.mubr.msk.bf16.mxu0 %vm2633_vm1, %v2632_v9 }
  0xb2   :  { %2313 = vmatprep.subr.bf16.mxu0 %v2632_v9  ;;  %2321 = vmatprep.mubr.msk.bf16.mxu1 %vm2633_vm1, %v2632_v9 }
  0xb5   :  { %2314 = vmatpush3.bf16.msra.mxu0 %v2529_v41 }
  0xb6   :  { %2325 = vmatprep.subr.bf16.mxu0 %v2632_v9 }
  0xb8   :  { %2316 = vmatmul.mubr.msk.bf16.vlgmr.msra.gmra.mrb[4].mxu0 %vm22_vm0, %v2707_v40 }
  0xb9   :  { %2327 = vmatprep.mubr.msk.bf16.mxu0 %vm2633_vm1, %v2632_v9 }
 0x183   :  { %v126_v43 = vpop.f32.mrb[0].mxu0  ;;  %v188_v45 = vpop.f32.mrb[0].mxu1 }
 0x184   :  { %v2301_v46 = vpop.f32.mrb[1].mxu0  ;;  %v2309_v47 = vpop.f32.mrb[1].mxu1  ;;  %v127_v50 = vadd.f32 %v2115_v42, %v126_v43  ;;  %v189_v51 = vadd.f32 %v2119_v44, %v188_v45 }
 0x185   :  { %v129_v48 = vpop.f32.mrb[2].mxu0  ;;  %v191_v49 = vpop.f32.mrb[2].mxu1 }
 0x186   :  { %v130_v52 = vadd.f32 %v2115_v42, %v129_v48  ;;  %v192_v53 = vadd.f32 %v2119_v44, %v191_v49  ;;  %v2302_v54 = vpop.f32.mrb[3].mxu0  ;;  %v2310_v55 = vpop.f32.mrb[3].mxu1 }
 0x187   :  { %v2534_v55 = vld [vmem:[%s3145_s2 + $0x40] sm:$0xff]  }
 0x188   :  { %v257_v56 = vpack.c.bf16 %v130_v52, %v127_v50  ;;  %v258_v57 = vpack.c.bf16 %v192_v53, %v189_v51 }
 0x18a   :  { %v264_v58 = vsel %vm259_vm2, %v258_v57, 0  ;;  %v2535_v57 = vld [vmem:[%s3145_s2 + $0x48] sm:$0xff]  }
 0x18b   :  { %v250_v60 = vpop.f32.mrb[4].mxu0  ;;  %2320 = vmatpush3.bf16.xpose.msra.mxu1 %v264_v58 }
 0x18c   :  { %v2317_v61 = vpop.f32.mrb[5].mxu0  ;;  %2331 = vmatprep.subr.bf16.mxu1 %v2632_v9  ;;  %v251_v63 = vadd.f32 %v2123_v59, %v250_v60 }
 0x18d   :  { %v253_v62 = vpop.f32.mrb[6].mxu0 }
 0x18e   :  { %v254_v0 = vadd.f32 %v2123_v59, %v253_v62  ;;  %v2318_v1 = vpop.f32.mrb[7].mxu0  ;;  %v2133_v62 = vld [vmem:[%s3146_s3 + $0x6] ss:$0 sm:$0xff] }
 0x190   :  { %v334_v3 = vpack.c.bf16 %v254_v0, %v251_v63 }
 0x192   :  { %2322 = vmatmul.mubr.msk.bf16.vlgmr.msra.gmra.mrb[4].mxu1 %vm259_vm2, %v257_v56  ;;  %2326 = vmatpush3.bf16.msra.mxu0 %v334_v3 }
 0x193   :  { %2332 = vmatpush3.bf16.msra.mxu1 %v2530_v2  ;;  %2335 = vmatprep.mubr.msk.bf16.mxu1 %vm2633_vm1, %v2632_v9 }
 0x194   :  { %2333 = vmatprep.subr.bf16.mxu1 %v2632_v9  ;;  %2339 = vmatprep.subr.bf16.mxu0 %v2632_v9 }
 0x197   :  { %2334 = vmatpush3.bf16.msra.mxu1 %v2531_v4 }
 0x198   :  { %2347 = vmatprep.subr.bf16.mxu1 %v2632_v9 }
 0x19a   :  { %2336 = vmatmul.mubr.msk.bf16.vlgmr.msra.gmra.mrb[8].mxu1 %vm22_vm0, %v2707_v40 }
 0x19b   :  { %2348 = vmatpush3.bf16.msra.mxu1 %v2532_v5  ;;  %2351 = vmatprep.mubr.msk.bf16.mxu1 %vm2633_vm1, %v2632_v9 }
 0x19c   :  { %2349 = vmatprep.subr.bf16.mxu1 %v2632_v9 }
 0x19f   :  { %2350 = vmatpush3.bf16.msra.mxu1 %v2533_v6 }
 0x1a0   :  { %2361 = vmatprep.subr.bf16.mxu1 %v2632_v9 }
 0x1a2   :  { %2352 = vmatmul.mubr.msk.bf16.vlgmr.msra.gmra.mrb[12].mxu1 %vm22_vm0, %v2707_v40 }
 0x1a3   :  { %2363 = vmatprep.mubr.msk.bf16.mxu1 %vm2633_vm1, %v2632_v9 }
 0x265   :  { %v300_v7 = vpop.f32.mrb[4].mxu1 }
 0x266   :  { %v307_v10 = vmul.f32 0.25, %v300_v7  ;;  %v2323_v11 = vpop.f32.mrb[5].mxu1 }
 0x267   :  { %v303_v12 = vpop.f32.mrb[6].mxu1 }
 0x268   :  { %v308_v14 = vmul.f32 0.25, %v303_v12  ;;  %v2324_v15 = vpop.f32.mrb[7].mxu1  ;;  %v309_v16 = vadd.f32 %v307_v10, %v2768_v8 }
 0x26a   :  { %v311_v17 = vsel %vm259_vm2, %v309_v16, -inf  ;;  %v310_v18 = vadd.f32 %v308_v14, %v2773_v13 }
 0x26b   :  { %312 = vmax.xlane.f32.xlu0 %v311_v17 }
 0x26c   :  { %v314_v19 = vsel %vm259_vm2, %v310_v18, -inf }
 0x26d   :  { %315 = vmax.xlane.f32.xlu1 %v314_v19  ;;  %v434_v21 = vpop.f32.mrb[8].mxu1 }
 0x26e   :  { %v2337_v22 = vpop.f32.mrb[9].mxu1  ;;  %v2782_v24 = vadd.f32 %v2129_v20, %v434_v21 }
 0x26f   :  { %v437_v23 = vpop.f32.mrb[10].mxu1 }
 0x270   :  { %v438_v25 = vadd.f32 %v2129_v20, %v437_v23  ;;  %v2338_v26 = vpop.f32.mrb[11].mxu1 }
 0x272   :  { %v565_v27 = vpack.c.bf16 %v438_v25, %v2782_v24 }
 0x275   :  { %v558_v29 = vpop.f32.mrb[12].mxu1 }
 0x276   :  { %v2353_v30 = vpop.f32.mrb[13].mxu1  ;;  %v559_v32 = vadd.f32 %v2137_v28, %v558_v29 }
 0x277   :  { %v561_v31 = vpop.f32.mrb[14].mxu1 }
 0x278   :  { %v562_v33 = vadd.f32 %v2137_v28, %v561_v31  ;;  %v2354_v34 = vpop.f32.mrb[15].mxu1 }
 0x27a   :  { %v641_v35 = vpack.c.bf16 %v562_v33, %v559_v32 }
 0x27c   :  { %2362 = vmatpush3.bf16.msra.mxu1 %v641_v35 }
 0x27d   :  { %2375 = vmatprep.subr.bf16.mxu1 %v2632_v9 }
 0x2f8   :  { %v313_v36 = vpop.xlane.xlu0 %312 }
 0x2f9   :  { %v317_v39 = vsub.f32 %v309_v16, %v313_v36  ;;  %v2536_v36 = vld [vmem:[%s3145_s2 + $0x60] sm:$0xff]  }
 0x2fa   :  { %v316_v41 = vpop.xlane.xlu1 %315 }
 0x2fb   :  { %v319_v42 = vmul.f32 1.442695, %v317_v39  ;;  %v318_v43 = vsub.f32 %v310_v18, %v316_v41  ;;  %v2537_v39 = vld [vmem:[%s3145_s2 + $0x68] sm:$0xff]  }
 0x2fd   :  { %2572 = vpow2.f32 %v319_v42  ;;  %v321_v44 = vmul.f32 1.442695, %v318_v43 }
 0x2ff   :  { %2574 = vpow2.f32 %v321_v44 }
 0x307   :  { %v2573_v45 = vpop.eup %2572 }
 0x308   :  { %v323_v46 = vsel %vm259_vm2, %v2573_v45, 0.0 }
 0x309   :  { %v2575_v47 = vpop.eup %2574  ;;  %324 = vadd.xlane.f32.xlu0 %v323_v46 }
 0x30a   :  { %v326_v48 = vsel %vm259_vm2, %v2575_v47, 0.0 }
 0x30b   :  { %327 = vadd.xlane.f32.xlu1 %v326_v48 }
 0x396   :  { %v325_v49 = vpop.xlane.xlu0 %324 }
 0x397   :  { %2576 = vrcp.f32 %v325_v49 }
 0x398   :  { %v328_v50 = vpop.xlane.xlu1 %327 }
 0x399   :  { %2578 = vrcp.f32 %v328_v50 }
 0x3a1   :  { %v2577_v51 = vpop.eup %2576 }
 0x3a2   :  { %v331_v53 = vmul.f32 %v2577_v51, %v2573_v45 }
 0x3a3   :  { %v2579_v52 = vpop.eup %2578 }
 0x3a4   :  { %v332_v54 = vmul.f32 %v2579_v52, %v2575_v47  ;;  %v2143_v52 = vld [vmem:[%s3146_s3 + $0x8] ss:$0 sm:$0xff] }
 0x3a6   :  { %v333_v56 = vpack.c.bf16 %v332_v54, %v331_v53 }
 0x3a8   :  { %2328 = vmatmul.mubr.msk.bf16.vlgmr.msra.gmra.mrb[8].mxu0 %vm259_vm2, %v333_v56 }
 0x3a9   :  { %2340 = vmatpush3.bf16.msra.mxu0 %v2534_v55  ;;  %2343 = vmatprep.mubr.msk.bf16.mxu0 %vm2633_vm1, %v2632_v9 }
 0x3aa   :  { %2341 = vmatprep.subr.bf16.mxu0 %v2632_v9 }
 0x3ad   :  { %2342 = vmatpush3.bf16.msra.mxu0 %v2535_v57 }
 0x3ae   :  { %2355 = vmatprep.subr.bf16.mxu0 %v2632_v9 }
 0x3b0   :  { %2344 = vmatmul.mubr.msk.bf16.vlgmr.msra.gmra.mrb[12].mxu0 %vm22_vm0, %v2707_v40 }
 0x3b1   :  { %2357 = vmatprep.mubr.msk.bf16.mxu0 %vm2633_vm1, %v2632_v9 }
 0x47b   :  { %v2806_v58 = vpop.f32.mrb[8].mxu0 }
 0x47c   :  { %v2329_v59 = vpop.f32.mrb[9].mxu0 }
 0x47d   :  { %v2808_v60 = vpop.f32.mrb[10].mxu0 }
 0x47e   :  { %v2330_v61 = vpop.f32.mrb[11].mxu0 }
 0x483   :  { %v496_v63 = vpop.f32.mrb[12].mxu0 }
 0x484   :  { %v2345_v0 = vpop.f32.mrb[13].mxu0  ;;  %v497_v2 = vadd.f32 %v2133_v62, %v496_v63 }
 0x485   :  { %v499_v1 = vpop.f32.mrb[14].mxu0 }
 0x486   :  { %v500_v3 = vadd.f32 %v2133_v62, %v499_v1  ;;  %v2346_v4 = vpop.f32.mrb[15].mxu0 }
 0x488   :  { %v566_v40 = vpack.c.bf16 %v500_v3, %v497_v2 }
 0x48a   :  { %v571_v5 = vsel %vm259_vm2, %v566_v40, 0 }
 0x48b   :  { %2356 = vmatpush3.bf16.xpose.msra.mxu0 %v571_v5 }
 0x48c   :  { %2367 = vmatprep.subr.bf16.mxu0 %v2632_v9 }
 0x492   :  { %2358 = vmatmul.mubr.msk.bf16.vlgmr.msra.gmra.mrb[16].mxu0 %vm259_vm2, %v565_v27 }
 0x493   :  { %2371 = vmatprep.mubr.msk.bf16.mxu0 %vm2633_vm1, %v2632_v9  ;;  %2368 = vmatpush3.bf16.msra.mxu0 %v2536_v36  ;;  %v2149_v36 = vld [vmem:[%s3146_s3 + $0xb] ss:$0 sm:$0xff] }
 0x494   :  { %2369 = vmatprep.subr.bf16.mxu0 %v2632_v9 }
 0x497   :  { %2370 = vmatpush3.bf16.msra.mxu0 %v2537_v39 }
 0x498   :  { %2383 = vmatprep.subr.bf16.mxu0 %v2632_v9 }
 0x565   :  { %v607_v6 = vpop.f32.mrb[16].mxu0 }
 0x566   :  { %v614_v7 = vmul.f32 0.25, %v607_v6  ;;  %v2359_v10 = vpop.f32.mrb[17].mxu0 }
 0x567   :  { %v610_v11 = vpop.f32.mrb[18].mxu0 }
 0x568   :  { %v615_v12 = vmul.f32 0.25, %v610_v11  ;;  %v2360_v14 = vpop.f32.mrb[19].mxu0  ;;  %v616_v15 = vadd.f32 %v614_v7, %v2768_v8 }
 0x56a   :  { %v618_v16 = vsel %vm259_vm2, %v616_v15, -inf  ;;  %v617_v17 = vadd.f32 %v615_v12, %v2773_v13 }
 0x56b   :  { %619 = vmax.xlane.f32.xlu0 %v618_v16 }
 0x56c   :  { %v621_v18 = vsel %vm259_vm2, %v617_v17, -inf }
 0x56d   :  { %622 = vmax.xlane.f32.xlu1 %v621_v18 }
 0x5f8   :  { %v620_v19 = vpop.xlane.xlu0 %619 }
 0x5f9   :  { %v624_v20 = vsub.f32 %v616_v15, %v620_v19 }
 0x5fa   :  { %v623_v21 = vpop.xlane.xlu1 %622 }
 0x5fb   :  { %v626_v22 = vmul.f32 1.442695, %v624_v20  ;;  %v625_v23 = vsub.f32 %v617_v17, %v623_v21 }
 0x5fd   :  { %2580 = vpow2.f32 %v626_v22  ;;  %v628_v24 = vmul.f32 1.442695, %v625_v23  ;;  %v2147_v22 = vld [vmem:[%s3146_s3 + $0x9] ss:$0 sm:$0xff] }
 0x5ff   :  { %2582 = vpow2.f32 %v628_v24 }
 0x607   :  { %v2581_v25 = vpop.eup %2580 }
 0x608   :  { %v630_v26 = vsel %vm259_vm2, %v2581_v25, 0.0 }
 0x609   :  { %v2583_v27 = vpop.eup %2582  ;;  %631 = vadd.xlane.f32.xlu0 %v630_v26 }
 0x60a   :  { %v633_v28 = vsel %vm259_vm2, %v2583_v27, 0.0 }
 0x60b   :  { %634 = vadd.xlane.f32.xlu1 %v633_v28 }
 0x696   :  { %v632_v29 = vpop.xlane.xlu0 %631 }
 0x697   :  { %2584 = vrcp.f32 %v632_v29 }
 0x698   :  { %v635_v30 = vpop.xlane.xlu1 %634 }
 0x699   :  { %2586 = vrcp.f32 %v635_v30 }
 0x6a1   :  { %v2585_v31 = vpop.eup %2584 }
 0x6a2   :  { %v638_v33 = vmul.f32 %v2585_v31, %v2581_v25 }
 0x6a3   :  { %v2587_v32 = vpop.eup %2586 }
 0x6a4   :  { %v639_v34 = vmul.f32 %v2587_v32, %v2583_v27  ;;  %v2148_v27 = vld [vmem:[%s3146_s3 + $0xa] ss:$0 sm:$0xff]  ;;  %v2540_v32 = vld [vmem:[%s3145_s2 + $0x80] sm:$0xff]  }
 0x6a6   :  { %v640_v35 = vpack.c.bf16 %v639_v34, %v638_v33  ;;  %v2541_v33 = vld [vmem:[%s3145_s2 + $0x88] sm:$0xff]   ;;  %v2542_v34 = vld [vmem:[%s3145_s2 + $0x90] sm:$0xff]  }
 0x6a8   :  { %2364 = vmatmul.mubr.msk.bf16.vlgmr.msra.gmra.mrb[16].mxu1 %vm259_vm2, %v640_v35  ;;  %v2543_v35 = vld [vmem:[%s3145_s2 + $0x98] sm:$0xff]  }
 0x6a9   :  { %2379 = vmatprep.mubr.msk.bf16.mxu1 %vm2633_vm1, %v2632_v9 }
 0x77b   :  { %v679_v41 = vpop.f32.mrb[16].mxu1 }
 0x77c   :  { %v2365_v42 = vpop.f32.mrb[17].mxu1 }
 0x77d   :  { %v682_v43 = vpop.f32.mrb[18].mxu1 }
 0x77e   :  { %v2514_v44 = vpack.i.bf16 %v682_v43, %v679_v41  ;;  %v2366_v45 = vpop.f32.mrb[19].mxu1 }
 0x780   :  { %2515 = vrot.lane.b32.xlu0 %v2514_v44, %s2634_s12 }
 0x7f2   :  { %v2516_v46 = vpop.permute.xlu0 %2515 }
 0x7f3   :  { %v2518_v47 = vunpack.i.h.bf16 %v2516_v46  ;;  %v2517_v48 = vunpack.i.l.bf16 %v2516_v46 }
 0x7f5   :  { %v695_v49 = vsel %vm259_vm2, %v2808_v60, %v2518_v47  ;;  %v694_v50 = vsel %vm259_vm2, %v2806_v58, %v2517_v48 }
 0x7f6   :  { %v696_v51 = vpack.c.bf16 %v695_v49, %v694_v50 }
 0x7f8   :  { %2372 = vmatmul.mubr.msk.bf16.vlgmr.msra.gmra.mrb[20].mxu0 %vm22_vm0, %v696_v51 }
 0x7f9   :  { %2391 = vmatprep.mubr.msk.bf16.mxu0 %vm2633_vm1, %v2632_v9  ;;  %2384 = vmatpush3.bf16.msra.mxu0 %v2540_v32 }
 0x7fa   :  { %2385 = vmatprep.subr.bf16.mxu0 %v2632_v9 }
 0x7fd   :  { %2386 = vmatpush3.bf16.msra.mxu0 %v2541_v33 }
 0x7fe   :  { %2387 = vmatprep.subr.bf16.mxu0 %v2632_v9 }
 0x801   :  { %2388 = vmatpush3.bf16.msra.mxu0 %v2542_v34 }
 0x802   :  { %2389 = vmatprep.subr.bf16.mxu0 %v2632_v9 }
 0x805   :  { %2390 = vmatpush3.bf16.msra.mxu0 %v2543_v35 }
 0x806   :  { %2411 = vmatprep.subr.bf16.mxu0 %v2632_v9 }
 0x8cb   :  { %v755_v53 = vpop.f32.mrb[20].mxu0 }
 0x8cc   :  { %v756_v54 = vadd.f32 %v2143_v52, %v755_v53  ;;  %v2373_v55 = vpop.f32.mrb[21].mxu0 }
 0x8cd   :  { %v758_v56 = vpop.f32.mrb[22].mxu0 }
 0x8ce   :  { %v762_v57 = vadd.f32 %v756_v54, %v2698_v37  ;;  %v759_v59 = vadd.f32 %v2143_v52, %v758_v56  ;;  %v2374_v60 = vpop.f32.mrb[23].mxu0  ;;  %v2538_v37 = vld [vmem:[%s3145_s2 + $0x70] sm:$0xff]  }
 0x8cf   :  { %2376 = vmatpush3.bf16.msra.mxu1 %v2538_v37 }
 0x8d0   :  { %v763_v58 = vadd.f32 %v759_v59, %v2700_v38  ;;  %v766_v61 = vsel %vm22_vm0, %v762_v57, 0.0  ;;  %v774_v63 = vmul.f32 %v762_v57, %v762_v57  ;;  %v2539_v38 = vld [vmem:[%s3145_s2 + $0x78] sm:$0xff]   ;;  %2377 = vmatprep.subr.bf16.mxu1 %v2632_v9 }
 0x8d1   :  { %767 = vadd.xlane.f32.xlu1 %v766_v61 }
 0x8d2   :  { %v769_v62 = vsel %vm22_vm0, %v763_v58, 0.0  ;;  %v776_v0 = vsel %vm22_vm0, %v774_v63, 0.0  ;;  %v775_v1 = vmul.f32 %v763_v58, %v763_v58 }
 0x8d3   :  { %2378 = vmatpush3.bf16.msra.mxu1 %v2539_v38 }
 0x8d4   :  { %v779_v2 = vsel %vm22_vm0, %v775_v1, 0.0  ;;  %2395 = vmatprep.subr.bf16.mxu1 %v2632_v9  ;;  %v2153_v1 = vld [vmem:[%s3146_s3 + $0xc] ss:$0 sm:$0xff] }
 0x8d5   :  { %770 = vadd.xlane.f32.xlu1 %v769_v62 }
 0x8d9   :  { %777 = vadd.xlane.f32.xlu1 %v776_v0 }
 0x8dd   :  { %780 = vadd.xlane.f32.xlu1 %v779_v2 }
 0x95e   :  { %v768_v3 = vpop.xlane.xlu1 %767 }
 0x95f   :  { %v772_v40 = vmul.f32 0.03125, %v768_v3 }
 0x961   :  { %v784_v6 = vmul.f32 %v772_v40, %v772_v40  ;;  %v788_v19 = vsub.f32 %v762_v57, %v772_v40 }
 0x962   :  { %v771_v4 = vpop.xlane.xlu1 %770 }
 0x963   :  { %v773_v7 = vmul.f32 0.03125, %v771_v4 }
 0x965   :  { %v785_v14 = vmul.f32 %v773_v7, %v773_v7  ;;  %v789_v23 = vsub.f32 %v763_v58, %v773_v7 }
 0x966   :  { %v778_v5 = vpop.xlane.xlu1 %777 }
 0x967   :  { %v782_v10 = vmul.f32 0.03125, %v778_v5 }
 0x969   :  { %v786_v11 = vsub.f32 %v782_v10, %v784_v6 }
 0x96a   :  { %v781_v12 = vpop.xlane.xlu1 %780 }
 0x96b   :  { %v790_v15 = vadd.f32 1e-12, %v786_v11  ;;  %v783_v16 = vmul.f32 0.03125, %v781_v12 }
 0x96d   :  { %2588 = vrsqrt.f32 %v790_v15  ;;  %v787_v17 = vsub.f32 %v783_v16, %v785_v14  ;;  %v2544_v16 = vld [vmem:[%s3145_s2 + $0xa0] sm:$0xff]  }
 0x96f   :  { %v791_v18 = vadd.f32 1e-12, %v787_v17  ;;  %v2545_v17 = vld [vmem:[%s3145_s2 + $0xc0] sm:$0xff]  }
 0x971   :  { %2590 = vrsqrt.f32 %v791_v18  ;;  %v2546_v18 = vld [vmem:[%s3145_s2 + $0xa8] sm:$0xff]  }
 0x977   :  { %v2589_v20 = vpop.eup %2588 }
 0x978   :  { %v794_v21 = vmul.f32 %v2589_v20, %v788_v19  ;;  %v2547_v19 = vld [vmem:[%s3145_s2 + $0xc8] sm:$0xff]  }
 0x97a   :  { %v800_v26 = vmul.f32 %v2147_v22, %v794_v21 }
 0x97b   :  { %v2591_v24 = vpop.eup %2590 }
 0x97c   :  { %v795_v25 = vmul.f32 %v2591_v24, %v789_v23  ;;  %v806_v29 = vadd.f32 %v2148_v27, %v800_v26 }
 0x97e   :  { %v801_v28 = vmul.f32 %v2147_v22, %v795_v25 }
 0x980   :  { %v807_v30 = vadd.f32 %v2148_v27, %v801_v28 }
 0x982   :  { %v808_v31 = vpack.c.bf16 %v807_v30, %v806_v29 }
 0x984   :  { %2380 = vmatmul.mubr.msk.bf16.vlgmr.msra.gmra.mrb[20].mxu1 %vm22_vm0, %v808_v31 }
 0x985   :  { %2399 = vmatprep.mubr.msk.bf16.mxu1 %vm2633_vm1, %v2632_v9  ;;  %2396 = vmatpush3.bf16.msra.mxu1 %v2544_v16  ;;  %v2553_v16 = vld [vmem:[%s3145_s2 + $0xf8] sm:$0xff]  }
 0x986   :  { %2397 = vmatprep.subr.bf16.mxu1 %v2632_v9 }
 0x989   :  { %2398 = vmatpush3.bf16.msra.mxu1 %v2546_v18 }
 0x98a   :  { %2403 = vmatprep.subr.bf16.mxu1 %v2632_v9 }
 0xa57   :  { %v867_v39 = vpop.f32.mrb[20].mxu1 }
 0xa58   :  { %v868_v41 = vadd.f32 %v2149_v36, %v867_v39  ;;  %v2381_v42 = vpop.f32.mrb[21].mxu1  ;;  %v2159_v39 = vld [vmem:[%s3146_s3 + $0xd] ss:$0 sm:$0xff] }
 0xa59   :  { %v870_v43 = vpop.f32.mrb[22].mxu1 }
 0xa5a   :  { %v876_v44 = vmul.f32 0.044715, %v868_v41  ;;  %v871_v45 = vadd.f32 %v2149_v36, %v870_v43  ;;  %v2382_v46 = vpop.f32.mrb[23].mxu1  ;;  %v874_v60 = vmul.f32 0.5, %v868_v41 }
 0xa5c   :  { %v878_v47 = vmul.f32 %v876_v44, %v868_v41  ;;  %v877_v48 = vmul.f32 0.044715, %v871_v45  ;;  %v875_v58 = vmul.f32 0.5, %v871_v45 }
 0xa5e   :  { %v880_v49 = vmul.f32 %v878_v47, %v868_v41  ;;  %v879_v50 = vmul.f32 %v877_v48, %v871_v45 }
 0xa60   :  { %v882_v51 = vadd.f32 %v880_v49, %v868_v41  ;;  %v881_v52 = vmul.f32 %v879_v50, %v871_v45  ;;  %v2548_v49 = vld [vmem:[%s3145_s2 + $0xb0] sm:$0xff]  }
 0xa62   :  { %v884_v53 = vmul.f32 0.7978846, %v882_v51  ;;  %v883_v54 = vadd.f32 %v881_v52, %v871_v45  ;;  %v2160_v45 = vld [vmem:[%s3146_s3 + $0xe] ss:$0 sm:$0xff]  ;;  %v2549_v51 = vld [vmem:[%s3145_s2 + $0xb8] sm:$0xff]  }
 0xa63   :  { %v2161_v52 = vld [vmem:[%s3146_s3 + $0xf] ss:$0 sm:$0xff] }
 0xa64   :  { %2592 = vtanh.f32 %v884_v53  ;;  %v885_v55 = vmul.f32 0.7978846, %v883_v54  ;;  %v2169_v54 = vld [vmem:[%s3146_s3 + $0x11] ss:$0 sm:$0xff] }
 0xa66   :  { %2594 = vtanh.f32 %v885_v55 }
 0xa6e   :  { %v2593_v56 = vpop.eup %2592 }
 0xa6f   :  { %v888_v57 = vadd.f32 1.0, %v2593_v56 }
 0xa70   :  { %v2595_v59 = vpop.eup %2594 }
 0xa71   :  { %v889_v61 = vadd.f32 1.0, %v2595_v59  ;;  %v890_v62 = vmul.f32 %v888_v57, %v874_v60 }
 0xa73   :  { %v891_v63 = vmul.f32 %v889_v61, %v875_v58 }
 0xa75   :  { %v892_v0 = vpack.c.bf16 %v891_v63, %v890_v62 }
 0xa77   :  { %2392 = vmatmul.mubr.msk.bf16.vlgmr.msra.gmra.mrb[24].mxu0 %vm930_vm3, %v892_v0 }
 0xa78   :  { %2415 = vmatprep.mubr.msk.bf16.mxu0 %vm2633_vm1, %v2632_v9  ;;  %2412 = vmatpush3.bf16.msra.mxu0 %v2545_v17 }
 0xa79   :  { %2413 = vmatprep.subr.bf16.mxu0 %v2632_v9 }
 0xa7c   :  { %2414 = vmatpush3.bf16.msra.mxu0 %v2547_v19 }
 0xa7d   :  { %2425 = vmatprep.subr.bf16.mxu0 %v2632_v9 }
 0xb4a   :  { %v968_v2 = vpop.f32.mrb[24].mxu0 }
 0xb4b   :  { %v969_v37 = vadd.f32 %v2153_v1, %v968_v2  ;;  %v2393_v38 = vpop.f32.mrb[25].mxu0 }
 0xb4c   :  { %v971_v3 = vpop.f32.mrb[26].mxu0  ;;  %v2165_v38 = vld [vmem:[%s3146_s3 + $0x10] ss:$0 sm:$0xff] }
 0xb4d   :  { %v975_v4 = vadd.f32 %v969_v37, %v806_v29  ;;  %v972_v40 = vadd.f32 %v2153_v1, %v971_v3  ;;  %v2394_v5 = vpop.f32.mrb[27].mxu0 }
 0xb4f   :  { %v976_v6 = vadd.f32 %v972_v40, %v807_v30  ;;  %v979_v7 = vsel %vm22_vm0, %v975_v4, 0.0  ;;  %v987_v10 = vmul.f32 %v975_v4, %v975_v4 }
 0xb50   :  { %980 = vadd.xlane.f32.xlu1 %v979_v7 }
 0xb51   :  { %v989_v11 = vsel %vm22_vm0, %v987_v10, 0.0  ;;  %v982_v12 = vsel %vm22_vm0, %v976_v6, 0.0  ;;  %v988_v14 = vmul.f32 %v976_v6, %v976_v6 }
 0xb52   :  { %990 = vadd.xlane.f32.xlu0 %v989_v11 }
 0xb53   :  { %v992_v15 = vsel %vm22_vm0, %v988_v14, 0.0  ;;  %v2551_v14 = vld [vmem:[%s3145_s2 + $0xd8] sm:$0xff]  }
 0xb54   :  { %983 = vadd.xlane.f32.xlu1 %v982_v12  ;;  %v2550_v12 = vld [vmem:[%s3145_s2 + $0xd0] sm:$0xff]  }
 0xb58   :  { %993 = vadd.xlane.f32.xlu1 %v992_v15  ;;  %v2552_v15 = vld [vmem:[%s3145_s2 + $0xf0] sm:$0xff]  }
 0xbdd   :  { %v981_v20 = vpop.xlane.xlu1 %980 }
 0xbde   :  { %v985_v21 = vmul.f32 0.03125, %v981_v20 }
 0xbdf   :  { %v991_v22 = vpop.xlane.xlu0 %990 }
 0xbe0   :  { %v997_v23 = vmul.f32 %v985_v21, %v985_v21  ;;  %v995_v24 = vmul.f32 0.03125, %v991_v22  ;;  %v1001_v35 = vsub.f32 %v975_v4, %v985_v21 }
 0xbe1   :  { %v984_v25 = vpop.xlane.xlu1 %983 }
 0xbe2   :  { %v999_v26 = vsub.f32 %v995_v24, %v997_v23  ;;  %v986_v27 = vmul.f32 0.03125, %v984_v25 }
 0xbe4   :  { %v1003_v28 = vadd.f32 1e-12, %v999_v26  ;;  %v998_v30 = vmul.f32 %v986_v27, %v986_v27  ;;  %v1002_v41 = vsub.f32 %v976_v6, %v986_v27  ;;  %v2175_v26 = vld [vmem:[%s3146_s3 + $0x12] ss:$0 sm:$0xff] }
 0xbe5   :  { %v994_v29 = vpop.xlane.xlu1 %993 }
 0xbe6   :  { %2596 = vrsqrt.f32 %v1003_v28  ;;  %v996_v31 = vmul.f32 0.03125, %v994_v29 }
 0xbe8   :  { %v1000_v32 = vsub.f32 %v996_v31, %v998_v30 }
 0xbea   :  { %v1004_v33 = vadd.f32 1e-12, %v1000_v32 }
 0xbec   :  { %2598 = vrsqrt.f32 %v1004_v33 }
 0xbf0   :  { %v2597_v34 = vpop.eup %2596 }
 0xbf1   :  { %v1007_v36 = vmul.f32 %v2597_v34, %v1001_v35  ;;  %v2183_v35 = vld [vmem:[%s3146_s3 + $0x14] ss:$0 sm:$0xff] }
 0xbf3   :  { %v1013_v43 = vmul.f32 %v2159_v39, %v1007_v36 }
 0xbf5   :  { %v2920_v47 = vadd.f32 %v2160_v45, %v1013_v43 }
 0xbf6   :  { %v2599_v42 = vpop.eup %2598 }
 0xbf7   :  { %v1008_v44 = vmul.f32 %v2599_v42, %v1002_v41 }
 0xbf9   :  { %v1014_v46 = vmul.f32 %v2159_v39, %v1008_v44 }
 0xbfb   :  { %v2922_v48 = vadd.f32 %v2160_v45, %v1014_v46 }
 0xbfd   :  { %v2929_v50 = vpack.c.bf16 %v2922_v48, %v2920_v47 }
 0xbff   :  { %2400 = vmatmul.mubr.msk.bf16.vlgmr.msra.gmra.mrb[24].mxu1 %vm22_vm0, %v2929_v50  ;;  %2416 = vmatmul.mubr.msk.bf16.vlgmr.msra.gmra.mrb[28].mxu0 %vm22_vm0, %v2929_v50 }
 0xc00   :  { %2404 = vmatpush3.bf16.msra.mxu1 %v2548_v49  ;;  %2407 = vmatprep.mubr.msk.bf16.mxu1 %vm2633_vm1, %v2632_v9 }
 0xc01   :  { %2405 = vmatprep.subr.bf16.mxu1 %v2632_v9  ;;  %2427 = vmatprep.mubr.msk.bf16.mxu0 %vm2633_vm1, %v2632_v9 }
 0xc04   :  { %2406 = vmatpush3.bf16.msra.mxu1 %v2549_v51 }
 0xc05   :  { %2419 = vmatprep.subr.bf16.mxu1 %v2632_v9 }
 0xc07   :  { %2408 = vmatmul.mubr.msk.bf16.vlgmr.msra.gmra.mrb[28].mxu1 %vm22_vm0, %v2929_v50 }
 0xc08   :  { %2421 = vmatprep.mubr.msk.bf16.mxu1 %vm2633_vm1, %v2632_v9 }
 0xcd2   :  { %v1080_v53 = vpop.f32.mrb[24].mxu1  ;;  %v1204_v55 = vpop.f32.mrb[28].mxu0 }
 0xcd3   :  { %v2401_v56 = vpop.f32.mrb[25].mxu1  ;;  %v2417_v57 = vpop.f32.mrb[29].mxu0  ;;  %v1081_v58 = vadd.f32 %v2161_v52, %v1080_v53  ;;  %v1205_v61 = vadd.f32 %v2169_v54, %v1204_v55 }
 0xcd4   :  { %v1083_v59 = vpop.f32.mrb[26].mxu1  ;;  %v1207_v60 = vpop.f32.mrb[30].mxu0 }
 0xcd5   :  { %v1084_v62 = vadd.f32 %v2161_v52, %v1083_v59  ;;  %v1208_v63 = vadd.f32 %v2169_v54, %v1207_v60  ;;  %v2402_v0 = vpop.f32.mrb[27].mxu1  ;;  %v2418_v1 = vpop.f32.mrb[31].mxu0 }
 0xcd6   :  { %v2554_v1 = vld [vmem:[%s3145_s2 + $0xe0] sm:$0xff]  }
 0xcd7   :  { %v1211_v2 = vpack.c.bf16 %v1084_v62, %v1081_v58  ;;  %v1287_v37 = vpack.c.bf16 %v1208_v63, %v1205_v61 }
 0xcd9   :  { %2426 = vmatpush3.bf16.msra.mxu0 %v1287_v37  ;;  %v2555_v37 = vld [vmem:[%s3145_s2 + $0xe8] sm:$0xff]  }
 0xcda   :  { %v1142_v3 = vpop.f32.mrb[28].mxu1  ;;  %2439 = vmatprep.subr.bf16.mxu0 %v2632_v9 }
 0xcdb   :  { %v2409_v4 = vpop.f32.mrb[29].mxu1  ;;  %v1143_v5 = vadd.f32 %v2165_v38, %v1142_v3 }
 0xcdc   :  { %v1145_v40 = vpop.f32.mrb[30].mxu1 }
 0xcdd   :  { %v1146_v6 = vadd.f32 %v2165_v38, %v1145_v40  ;;  %v2410_v7 = vpop.f32.mrb[31].mxu1 }
 0xcdf   :  { %v1212_v10 = vpack.c.bf16 %v1146_v6, %v1143_v5  ;;  %v2179_v5 = vld [vmem:[%s3146_s3 + $0x13] ss:$0 sm:$0xff] }
 0xce1   :  { %v1217_v11 = vsel %vm259_vm2, %v1212_v10, 0 }
 0xce2   :  { %2420 = vmatpush3.bf16.xpose.msra.mxu1 %v1217_v11 }
 0xce3   :  { %2431 = vmatprep.subr.bf16.mxu1 %v2632_v9 }
 0xce9   :  { %2422 = vmatmul.mubr.msk.bf16.vlgmr.msra.gmra.mrb[32].mxu1 %vm259_vm2, %v1211_v2 }
 0xcea   :  { %2432 = vmatpush3.bf16.msra.mxu1 %v2550_v12  ;;  %2435 = vmatprep.mubr.msk.bf16.mxu1 %vm2633_vm1, %v2632_v9 }
 0xceb   :  { %2433 = vmatprep.subr.bf16.mxu1 %v2632_v9 }
 0xcee   :  { %2434 = vmatpush3.bf16.msra.mxu1 %v2551_v14 }
 0xcef   :  { %2447 = vmatprep.subr.bf16.mxu1 %v2632_v9 }
 0xcf1   :  { %2436 = vmatmul.mubr.msk.bf16.vlgmr.msra.gmra.mrb[36].mxu1 %vm22_vm0, %v2929_v50 }
 0xcf2   :  { %2448 = vmatpush3.bf16.msra.mxu1 %v2552_v15  ;;  %2451 = vmatprep.mubr.msk.bf16.mxu1 %vm2633_vm1, %v2632_v9 }
 0xcf3   :  { %2449 = vmatprep.subr.bf16.mxu1 %v2632_v9 }
 0xcf6   :  { %2450 = vmatpush3.bf16.msra.mxu1 %v2553_v16 }
 0xcf7   :  { %2461 = vmatprep.subr.bf16.mxu1 %v2632_v9 }
 0xcf9   :  { %2452 = vmatmul.mubr.msk.bf16.vlgmr.msra.gmra.mrb[40].mxu1 %vm22_vm0, %v2929_v50 }
 0xcfa   :  { %2463 = vmatprep.mubr.msk.bf16.mxu1 %vm2633_vm1, %v2632_v9 }
 0xdbc   :  { %v1253_v17 = vpop.f32.mrb[32].mxu1 }
 0xdbd   :  { %v1260_v18 = vmul.f32 0.25, %v1253_v17  ;;  %v2423_v19 = vpop.f32.mrb[33].mxu1 }
 0xdbe   :  { %v1256_v20 = vpop.f32.mrb[34].mxu1 }
 0xdbf   :  { %v1261_v21 = vmul.f32 0.25, %v1256_v20  ;;  %v2424_v22 = vpop.f32.mrb[35].mxu1  ;;  %v1262_v23 = vadd.f32 %v1260_v18, %v2768_v8 }
 0xdc1   :  { %v1264_v24 = vsel %vm259_vm2, %v1262_v23, -inf  ;;  %v1263_v25 = vadd.f32 %v1261_v21, %v2773_v13 }
 0xdc2   :  { %1265 = vmax.xlane.f32.xlu1 %v1264_v24 }
 0xdc3   :  { %v1267_v29 = vsel %vm259_vm2, %v1263_v25, -inf }
 0xdc4   :  { %v1387_v27 = vpop.f32.mrb[36].mxu1 }
 0xdc5   :  { %v2437_v28 = vpop.f32.mrb[37].mxu1  ;;  %v2994_v31 = vadd.f32 %v2175_v26, %v1387_v27 }
 0xdc6   :  { %1268 = vmax.xlane.f32.xlu1 %v1267_v29  ;;  %v1390_v30 = vpop.f32.mrb[38].mxu1 }
 0xdc7   :  { %v1391_v32 = vadd.f32 %v2175_v26, %v1390_v30  ;;  %v2438_v33 = vpop.f32.mrb[39].mxu1 }
 0xdc9   :  { %v1518_v34 = vpack.c.bf16 %v1391_v32, %v2994_v31 }
 0xdcc   :  { %v1511_v36 = vpop.f32.mrb[40].mxu1 }
 0xdcd   :  { %v2453_v39 = vpop.f32.mrb[41].mxu1  ;;  %v1512_v42 = vadd.f32 %v2183_v35, %v1511_v36 }
 0xdce   :  { %v1514_v41 = vpop.f32.mrb[42].mxu1 }
 0xdcf   :  { %v1515_v43 = vadd.f32 %v2183_v35, %v1514_v41  ;;  %v2454_v44 = vpop.f32.mrb[43].mxu1 }
 0xdd0   :  { %v2556_v44 = vld [vmem:[%s3145_s2 + $0x100] sm:$0xff]  }
 0xdd1   :  { %v1594_v45 = vpack.c.bf16 %v1515_v43, %v1512_v42 }
 0xdd3   :  { %2462 = vmatpush3.bf16.msra.mxu1 %v1594_v45  ;;  %v2557_v45 = vld [vmem:[%s3145_s2 + $0x108] sm:$0xff]  }
 0xdd4   :  { %2475 = vmatprep.subr.bf16.mxu1 %v2632_v9 }
 0xe4f   :  { %v1266_v46 = vpop.xlane.xlu1 %1265 }
 0xe50   :  { %v1270_v49 = vsub.f32 %v1262_v23, %v1266_v46 }
 0xe52   :  { %v1272_v51 = vmul.f32 1.442695, %v1270_v49 }
 0xe53   :  { %v1269_v52 = vpop.xlane.xlu1 %1268 }
 0xe54   :  { %2600 = vpow2.f32 %v1272_v51  ;;  %v1271_v53 = vsub.f32 %v1263_v25, %v1269_v52 }
 0xe56   :  { %v1274_v54 = vmul.f32 1.442695, %v1271_v53 }
 0xe58   :  { %2602 = vpow2.f32 %v1274_v54 }
 0xe5e   :  { %v2601_v55 = vpop.eup %2600 }
 0xe5f   :  { %v1276_v56 = vsel %vm259_vm2, %v2601_v55, 0.0 }
 0xe60   :  { %1277 = vadd.xlane.f32.xlu1 %v1276_v56 }
 0xe62   :  { %v2603_v57 = vpop.eup %2602 }
 0xe63   :  { %v1279_v59 = vsel %vm259_vm2, %v2603_v57, 0.0 }
 0xe64   :  { %1280 = vadd.xlane.f32.xlu1 %v1279_v59 }
 0xeed   :  { %v1278_v60 = vpop.xlane.xlu1 %1277 }
 0xeee   :  { %2604 = vrcp.f32 %v1278_v60 }
 0xef1   :  { %v1281_v58 = vpop.xlane.xlu1 %1280 }
 0xef2   :  { %2606 = vrcp.f32 %v1281_v58  ;;  %v2189_v58 = vld [vmem:[%s3146_s3 + $0x15] ss:$0 sm:$0xff] }
 0xef8   :  { %v2605_v61 = vpop.eup %2604 }
 0xef9   :  { %v1284_v63 = vmul.f32 %v2605_v61, %v2601_v55 }
 0xefc   :  { %v2607_v62 = vpop.eup %2606 }
 0xefd   :  { %v1285_v0 = vmul.f32 %v2607_v62, %v2603_v57 }
 0xeff   :  { %v1286_v2 = vpack.c.bf16 %v1285_v0, %v1284_v63 }
 0xf01   :  { %2428 = vmatmul.mubr.msk.bf16.vlgmr.msra.gmra.mrb[32].mxu0 %vm259_vm2, %v1286_v2 }
 0xf02   :  { %2440 = vmatpush3.bf16.msra.mxu0 %v2554_v1  ;;  %2443 = vmatprep.mubr.msk.bf16.mxu0 %vm2633_vm1, %v2632_v9 }
 0xf03   :  { %2441 = vmatprep.subr.bf16.mxu0 %v2632_v9 }
 0xf06   :  { %2442 = vmatpush3.bf16.msra.mxu0 %v2555_v37 }
 0xf07   :  { %2455 = vmatprep.subr.bf16.mxu0 %v2632_v9 }
 0xf09   :  { %2444 = vmatmul.mubr.msk.bf16.vlgmr.msra.gmra.mrb[36].mxu0 %vm22_vm0, %v2929_v50 }
 0xf0a   :  { %2457 = vmatprep.mubr.msk.bf16.mxu0 %vm2633_vm1, %v2632_v9 }
 0xfd4   :  { %v3018_v38 = vpop.f32.mrb[32].mxu0 }
 0xfd5   :  { %v2429_v3 = vpop.f32.mrb[33].mxu0 }
 0xfd6   :  { %v3020_v4 = vpop.f32.mrb[34].mxu0 }
 0xfd7   :  { %v2430_v40 = vpop.f32.mrb[35].mxu0 }
 0xfdc   :  { %v1449_v6 = vpop.f32.mrb[36].mxu0 }
 0xfdd   :  { %v2445_v7 = vpop.f32.mrb[37].mxu0  ;;  %v1450_v11 = vadd.f32 %v2179_v5, %v1449_v6 }
 0xfde   :  { %v1452_v10 = vpop.f32.mrb[38].mxu0 }
 0xfdf   :  { %v1453_v12 = vadd.f32 %v2179_v5, %v1452_v10  ;;  %v2446_v14 = vpop.f32.mrb[39].mxu0 }
 0xfe1   :  { %v1519_v50 = vpack.c.bf16 %v1453_v12, %v1450_v11 }
 0xfe3   :  { %v1524_v15 = vsel %vm259_vm2, %v1519_v50, 0 }
 0xfe4   :  { %2456 = vmatpush3.bf16.xpose.msra.mxu0 %v1524_v15 }
 0xfe5   :  { %2467 = vmatprep.subr.bf16.mxu0 %v2632_v9 }
 0xfeb   :  { %2458 = vmatmul.mubr.msk.bf16.vlgmr.msra.gmra.mrb[40].mxu0 %vm259_vm2, %v1518_v34 }
 0xfec   :  { %2471 = vmatprep.mubr.msk.bf16.mxu0 %vm2633_vm1, %v2632_v9  ;;  %2468 = vmatpush3.bf16.msra.mxu0 %v2556_v44 }
 0xfed   :  { %2469 = vmatprep.subr.bf16.mxu0 %v2632_v9 }
 0xff0   :  { %2470 = vmatpush3.bf16.msra.mxu0 %v2557_v45 }
 0xff1   :  { %2483 = vmatprep.subr.bf16.mxu0 %v2632_v9 }
0x10be   :  { %v1560_v16 = vpop.f32.mrb[40].mxu0 }
0x10bf   :  { %v1567_v17 = vmul.f32 0.25, %v1560_v16  ;;  %v2459_v18 = vpop.f32.mrb[41].mxu0 }
0x10c0   :  { %v1563_v19 = vpop.f32.mrb[42].mxu0 }
0x10c1   :  { %v1568_v20 = vmul.f32 0.25, %v1563_v19  ;;  %v2460_v21 = vpop.f32.mrb[43].mxu0  ;;  %v1569_v22 = vadd.f32 %v1567_v17, %v2768_v8 }
0x10c3   :  { %v1571_v23 = vsel %vm259_vm2, %v1569_v22, -inf  ;;  %v1570_v24 = vadd.f32 %v1568_v20, %v2773_v13 }
0x10c4   :  { %1572 = vmax.xlane.f32.xlu1 %v1571_v23 }
0x10c5   :  { %v1574_v25 = vsel %vm259_vm2, %v1570_v24, -inf }
0x10c8   :  { %1575 = vmax.xlane.f32.xlu1 %v1574_v25 }
0x1151   :  { %v1573_v26 = vpop.xlane.xlu1 %1572 }
0x1152   :  { %v1577_v27 = vsub.f32 %v1569_v22, %v1573_v26 }
0x1154   :  { %v1579_v28 = vmul.f32 1.442695, %v1577_v27  ;;  %v2193_v27 = vld [vmem:[%s3146_s3 + $0x16] ss:$0 sm:$0xff] }
0x1155   :  { %v1576_v29 = vpop.xlane.xlu1 %1575 }
0x1156   :  { %2608 = vpow2.f32 %v1579_v28  ;;  %v1578_v30 = vsub.f32 %v1570_v24, %v1576_v29 }
0x1158   :  { %v1581_v31 = vmul.f32 1.442695, %v1578_v30 }
0x115a   :  { %2610 = vpow2.f32 %v1581_v31 }
0x1160   :  { %v2609_v32 = vpop.eup %2608 }
0x1161   :  { %v1583_v33 = vsel %vm259_vm2, %v2609_v32, 0.0 }
0x1162   :  { %1584 = vadd.xlane.f32.xlu1 %v1583_v33 }
0x1164   :  { %v2611_v8 = vpop.eup %2610 }
0x1165   :  { %v1586_v34 = vsel %vm259_vm2, %v2611_v8, 0.0 }
0x1166   :  { %1587 = vadd.xlane.f32.xlu0 %v1586_v34 }
0x11ef   :  { %v1585_v13 = vpop.xlane.xlu1 %1584 }
0x11f0   :  { %2612 = vrcp.f32 %v1585_v13 }
0x11f3   :  { %v1588_v35 = vpop.xlane.xlu0 %1587 }
0x11f4   :  { %2614 = vrcp.f32 %v1588_v35  ;;  %v2560_v35 = vld [vmem:[%s3145_s2 + $0x120] sm:$0xff]  }
0x11fa   :  { %v2613_v36 = vpop.eup %2612 }
0x11fb   :  { %v1591_v41 = vmul.f32 %v2613_v36, %v2609_v32  ;;  %v2194_v32 = vld [vmem:[%s3146_s3 + $0x17] ss:$0 sm:$0xff]  ;;  %v2561_v36 = vld [vmem:[%s3145_s2 + $0x128] sm:$0xff]  }
0x11fe   :  { %v2615_v39 = vpop.eup %2614 }
0x11ff   :  { %v1592_v42 = vmul.f32 %v2615_v39, %v2611_v8  ;;  %v2562_v39 = vld [vmem:[%s3145_s2 + $0x130] sm:$0xff]  }
0x1201   :  { %v1593_v43 = vpack.c.bf16 %v1592_v42, %v1591_v41  ;;  %v2563_v41 = vld [vmem:[%s3145_s2 + $0x138] sm:$0xff]  }
0x1202   :  { %v2195_v42 = vld [vmem:[%s3146_s3 + $0x18] ss:$0 sm:$0xff] }
0x1203   :  { %2464 = vmatmul.mubr.msk.bf16.vlgmr.msra.gmra.mrb[44].mxu1 %vm259_vm2, %v1593_v43 }
0x1204   :  { %2479 = vmatprep.mubr.msk.bf16.mxu1 %vm2633_vm1, %v2632_v9 }
0x12d6   :  { %v1632_v46 = vpop.f32.mrb[44].mxu1 }
0x12d7   :  { %v2465_v49 = vpop.f32.mrb[45].mxu1 }
0x12d8   :  { %v1635_v51 = vpop.f32.mrb[46].mxu1 }
0x12d9   :  { %v2519_v52 = vpack.i.bf16 %v1635_v51, %v1632_v46  ;;  %v2466_v53 = vpop.f32.mrb[47].mxu1 }
0x12db   :  { %2520 = vrot.lane.b32.xlu1 %v2519_v52, %s2634_s12 }
0x134d   :  { %v2521_v54 = vpop.permute.xlu1 %2520 }
0x134e   :  { %v2523_v55 = vunpack.i.h.bf16 %v2521_v54  ;;  %v2522_v56 = vunpack.i.l.bf16 %v2521_v54 }
0x1350   :  { %v1648_v57 = vsel %vm259_vm2, %v3020_v4, %v2523_v55  ;;  %v1647_v59 = vsel %vm259_vm2, %v3018_v38, %v2522_v56 }
0x1351   :  { %v1649_v60 = vpack.c.bf16 %v1648_v57, %v1647_v59 }
0x1353   :  { %2472 = vmatmul.mubr.msk.bf16.vlgmr.msra.gmra.mrb[44].mxu0 %vm22_vm0, %v1649_v60 }
0x1354   :  { %2491 = vmatprep.mubr.msk.bf16.mxu0 %vm2633_vm1, %v2632_v9  ;;  %2484 = vmatpush3.bf16.msra.mxu0 %v2560_v35 }
0x1355   :  { %2485 = vmatprep.subr.bf16.mxu0 %v2632_v9 }
0x1358   :  { %2486 = vmatpush3.bf16.msra.mxu0 %v2561_v36  ;;  %v2205_v36 = vld [vmem:[%s3146_s3 + $0x1a] ss:$0 sm:$0xff] }
0x1359   :  { %2487 = vmatprep.subr.bf16.mxu0 %v2632_v9 }
0x135c   :  { %2488 = vmatpush3.bf16.msra.mxu0 %v2562_v39 }
0x135d   :  { %2489 = vmatprep.subr.bf16.mxu0 %v2632_v9 }
0x1360   :  { %2490 = vmatpush3.bf16.msra.mxu0 %v2563_v41 }
0x1426   :  { %v1708_v61 = vpop.f32.mrb[44].mxu0 }
0x1427   :  { %v1709_v62 = vadd.f32 %v2189_v58, %v1708_v61  ;;  %v2473_v63 = vpop.f32.mrb[45].mxu0 }
0x1428   :  { %v1711_v0 = vpop.f32.mrb[46].mxu0 }
0x1429   :  { %v1715_v1 = vadd.f32 %v1709_v62, %v2920_v47  ;;  %v1712_v2 = vadd.f32 %v2189_v58, %v1711_v0  ;;  %v2474_v37 = vpop.f32.mrb[47].mxu0  ;;  %v2558_v47 = vld [vmem:[%s3145_s2 + $0x110] sm:$0xff]  }
0x142a   :  { %2476 = vmatpush3.bf16.msra.mxu1 %v2558_v47 }
0x142b   :  { %v1716_v38 = vadd.f32 %v1712_v2, %v2922_v48  ;;  %v1719_v3 = vsel %vm22_vm0, %v1715_v1, 0.0  ;;  %v1727_v40 = vmul.f32 %v1715_v1, %v1715_v1  ;;  %v2559_v48 = vld [vmem:[%s3145_s2 + $0x118] sm:$0xff]   ;;  %2477 = vmatprep.subr.bf16.mxu1 %v2632_v9 }
0x142c   :  { %1720 = vadd.xlane.f32.xlu0 %v1719_v3 }
0x142d   :  { %v1722_v4 = vsel %vm22_vm0, %v1716_v38, 0.0  ;;  %v1729_v5 = vsel %vm22_vm0, %v1727_v40, 0.0  ;;  %v1728_v6 = vmul.f32 %v1716_v38, %v1716_v38  ;;  %v2199_v40 = vld [vmem:[%s3146_s3 + $0x19] ss:$0 sm:$0xff] }
0x142e   :  { %2478 = vmatpush3.bf16.msra.mxu1 %v2559_v48 }
0x142f   :  { %v1732_v7 = vsel %vm22_vm0, %v1728_v6, 0.0  ;;  %2495 = vmatprep.subr.bf16.mxu1 %v2632_v9 }
0x1430   :  { %1723 = vadd.xlane.f32.xlu0 %v1722_v4 }
0x1434   :  { %1730 = vadd.xlane.f32.xlu0 %v1729_v5 }
0x1438   :  { %1733 = vadd.xlane.f32.xlu0 %v1732_v7 }
0x14b9   :  { %v1721_v10 = vpop.xlane.xlu0 %1720 }
0x14ba   :  { %v1725_v12 = vmul.f32 0.03125, %v1721_v10 }
0x14bc   :  { %v1737_v50 = vmul.f32 %v1725_v12, %v1725_v12  ;;  %v1741_v24 = vsub.f32 %v1715_v1, %v1725_v12 }
0x14bd   :  { %v1724_v11 = vpop.xlane.xlu0 %1723 }
0x14be   :  { %v1726_v15 = vmul.f32 0.03125, %v1724_v11 }
0x14c0   :  { %v1738_v19 = vmul.f32 %v1726_v15, %v1726_v15  ;;  %v1742_v28 = vsub.f32 %v1716_v38, %v1726_v15 }
0x14c1   :  { %v1731_v14 = vpop.xlane.xlu0 %1730 }
0x14c2   :  { %v1735_v16 = vmul.f32 0.03125, %v1731_v14 }
0x14c4   :  { %v1739_v17 = vsub.f32 %v1735_v16, %v1737_v50 }
0x14c5   :  { %v1734_v18 = vpop.xlane.xlu0 %1733 }
0x14c6   :  { %v1743_v20 = vadd.f32 1e-12, %v1739_v17  ;;  %v1736_v21 = vmul.f32 0.03125, %v1734_v18 }
0x14c8   :  { %2616 = vrsqrt.f32 %v1743_v20  ;;  %v1740_v22 = vsub.f32 %v1736_v21, %v1738_v19  ;;  %v2564_v19 = vld [vmem:[%s3145_s2 + $0x140] sm:$0xff]   ;;  %v2565_v20 = vld [vmem:[%s3145_s2 + $0x148] sm:$0xff]  }
0x14ca   :  { %v1744_v23 = vadd.f32 1e-12, %v1740_v22 }
0x14cc   :  { %2618 = vrsqrt.f32 %v1744_v23 }
0x14d2   :  { %v2617_v25 = vpop.eup %2616 }
0x14d3   :  { %v1747_v26 = vmul.f32 %v2617_v25, %v1741_v24 }
0x14d5   :  { %v1753_v31 = vmul.f32 %v2193_v27, %v1747_v26 }
0x14d6   :  { %v2619_v29 = vpop.eup %2618 }
0x14d7   :  { %v1748_v30 = vmul.f32 %v2619_v29, %v1742_v28  ;;  %v1759_v8 = vadd.f32 %v2194_v32, %v1753_v31 }
0x14d9   :  { %v1754_v33 = vmul.f32 %v2193_v27, %v1748_v30 }
0x14db   :  { %v1760_v34 = vadd.f32 %v2194_v32, %v1754_v33 }
0x14dd   :  { %v1761_v13 = vpack.c.bf16 %v1760_v34, %v1759_v8 }
0x14df   :  { %2480 = vmatmul.mubr.msk.bf16.vlgmr.msra.gmra.mrb[48].mxu1 %vm22_vm0, %v1761_v13 }
0x14e0   :  { %2499 = vmatprep.mubr.msk.bf16.mxu1 %vm2633_vm1, %v2632_v9  ;;  %2496 = vmatpush3.bf16.msra.mxu1 %v2564_v19 }
0x14e1   :  { %2497 = vmatprep.subr.bf16.mxu1 %v2632_v9 }
0x14e4   :  { %2498 = vmatpush3.bf16.msra.mxu1 %v2565_v20 }
0x14e5   :  { %2503 = vmatprep.subr.bf16.mxu1 %v2632_v9 }
0x15b2   :  { %v1820_v43 = vpop.f32.mrb[48].mxu1 }
0x15b3   :  { %v1821_v44 = vadd.f32 %v2195_v42, %v1820_v43  ;;  %v2481_v45 = vpop.f32.mrb[49].mxu1 }
0x15b4   :  { %v1823_v46 = vpop.f32.mrb[50].mxu1 }
0x15b5   :  { %v1829_v49 = vmul.f32 0.044715, %v1821_v44  ;;  %v1824_v51 = vadd.f32 %v2195_v42, %v1823_v46  ;;  %v2482_v52 = vpop.f32.mrb[51].mxu1  ;;  %v1827_v1 = vmul.f32 0.5, %v1821_v44 }
0x15b6   :  { %v2566_v52 = vld [vmem:[%s3145_s2 + $0x150] sm:$0xff]  }
0x15b7   :  { %v1831_v53 = vmul.f32 %v1829_v49, %v1821_v44  ;;  %v1830_v54 = vmul.f32 0.044715, %v1824_v51  ;;  %v1828_v2 = vmul.f32 0.5, %v1824_v51 }
0x15b9   :  { %v1833_v55 = vmul.f32 %v1831_v53, %v1821_v44  ;;  %v1832_v56 = vmul.f32 %v1830_v54, %v1824_v51  ;;  %v2567_v53 = vld [vmem:[%s3145_s2 + $0x158] sm:$0xff]  }
0x15ba   :  { %v2207_v54 = vld [vmem:[%s3146_s3 + $0x1c] ss:$0 sm:$0xff] }
0x15bb   :  { %v1835_v57 = vadd.f32 %v1833_v55, %v1821_v44  ;;  %v1834_v59 = vmul.f32 %v1832_v56, %v1824_v51  ;;  %v2206_v44 = vld [vmem:[%s3146_s3 + $0x1b] ss:$0 sm:$0xff] }
0x15bd   :  { %v1837_v60 = vmul.f32 0.7978846, %v1835_v57  ;;  %v1836_v58 = vadd.f32 %v1834_v59, %v1824_v51 }
0x15bf   :  { %2620 = vtanh.f32 %v1837_v60  ;;  %v1838_v61 = vmul.f32 0.7978846, %v1836_v58 }
0x15c1   :  { %2622 = vtanh.f32 %v1838_v61 }
0x15c9   :  { %v2621_v62 = vpop.eup %2620 }
0x15ca   :  { %v1841_v63 = vadd.f32 1.0, %v2621_v62 }
0x15cb   :  { %v2623_v0 = vpop.eup %2622 }
0x15cc   :  { %v1842_v37 = vadd.f32 1.0, %v2623_v0  ;;  %v1843_v38 = vmul.f32 %v1841_v63, %v1827_v1 }
0x15ce   :  { %v1844_v3 = vmul.f32 %v1842_v37, %v1828_v2 }
0x15d0   :  { %v1845_v4 = vpack.c.bf16 %v1844_v3, %v1843_v38 }
0x15d2   :  { %2492 = vmatmul.mubr.msk.bf16.vlgmr.msra.gmra.mrb[48].mxu0 %vm930_vm3, %v1845_v4 }
0x16a5   :  { %v1920_v5 = vpop.f32.mrb[48].mxu0 }
0x16a6   :  { %v1921_v6 = vadd.f32 %v2199_v40, %v1920_v5  ;;  %v2493_v7 = vpop.f32.mrb[49].mxu0 }
0x16a7   :  { %v1923_v47 = vpop.f32.mrb[50].mxu0 }
0x16a8   :  { %v1927_v48 = vadd.f32 %v1921_v6, %v1759_v8  ;;  %v1924_v10 = vadd.f32 %v2199_v40, %v1923_v47  ;;  %v2494_v11 = vpop.f32.mrb[51].mxu0 }
0x16aa   :  { %v1928_v12 = vadd.f32 %v1924_v10, %v1760_v34  ;;  %v1931_v14 = vsel %vm22_vm0, %v1927_v48, 0.0  ;;  %v1939_v50 = vmul.f32 %v1927_v48, %v1927_v48 }
0x16ab   :  { %1932 = vadd.xlane.f32.xlu0 %v1931_v14 }
0x16ac   :  { %v1934_v15 = vsel %vm22_vm0, %v1928_v12, 0.0  ;;  %v1941_v16 = vsel %vm22_vm0, %v1939_v50, 0.0  ;;  %v1940_v17 = vmul.f32 %v1928_v12, %v1928_v12 }
0x16ad   :  { %1935 = vadd.xlane.f32.xlu1 %v1934_v15 }
0x16ae   :  { %v1944_v18 = vsel %vm22_vm0, %v1940_v17, 0.0 }
0x16af   :  { %1942 = vadd.xlane.f32.xlu0 %v1941_v16 }
0x16b3   :  { %1945 = vadd.xlane.f32.xlu0 %v1944_v18 }
0x1738   :  { %v1933_v21 = vpop.xlane.xlu0 %1932 }
0x1739   :  { %v1937_v22 = vmul.f32 0.03125, %v1933_v21 }
0x173a   :  { %v1936_v23 = vpop.xlane.xlu1 %1935 }
0x173b   :  { %v1949_v25 = vmul.f32 %v1937_v22, %v1937_v22  ;;  %v1938_v26 = vmul.f32 0.03125, %v1936_v23  ;;  %v1953_v34 = vsub.f32 %v1927_v48, %v1937_v22 }
0x173c   :  { %v1943_v24 = vpop.xlane.xlu0 %1942 }
0x173d   :  { %v1947_v27 = vmul.f32 0.03125, %v1943_v24  ;;  %v1950_v30 = vmul.f32 %v1938_v26, %v1938_v26  ;;  %v1954_v39 = vsub.f32 %v1928_v12, %v1938_v26 }
0x173f   :  { %v1951_v28 = vsub.f32 %v1947_v27, %v1949_v25 }
0x1740   :  { %v1946_v29 = vpop.xlane.xlu0 %1945 }
0x1741   :  { %v1955_v31 = vadd.f32 1e-12, %v1951_v28  ;;  %v1948_v32 = vmul.f32 0.03125, %v1946_v29 }
0x1743   :  { %2624 = vrsqrt.f32 %v1955_v31  ;;  %v1952_v33 = vsub.f32 %v1948_v32, %v1950_v30 }
0x1745   :  { %v1956_v8 = vadd.f32 1e-12, %v1952_v33 }
0x1747   :  { %2626 = vrsqrt.f32 %v1956_v8 }
0x174d   :  { %v2625_v13 = vpop.eup %2624 }
0x174e   :  { %v1959_v35 = vmul.f32 %v2625_v13, %v1953_v34 }
0x1750   :  { %v1965_v43 = vmul.f32 %v2205_v36, %v1959_v35 }
0x1751   :  { %v2627_v41 = vpop.eup %2626 }
0x1752   :  { %v1960_v42 = vmul.f32 %v2627_v41, %v1954_v39  ;;  %v1971_v46 = vadd.f32 %v2206_v44, %v1965_v43 }
0x1754   :  { %v1966_v45 = vmul.f32 %v2205_v36, %v1960_v42 }
0x1756   :  { %v1972_v49 = vadd.f32 %v2206_v44, %v1966_v45 }
0x1758   :  { %v1973_v51 = vpack.c.bf16 %v1972_v49, %v1971_v46 }
0x175a   :  { %2500 = vmatmul.mubr.msk.bf16.vlgmr.msra.gmra.mrb[52].mxu1 %vm22_vm0, %v1973_v51 }
0x175b   :  { %2507 = vmatprep.mubr.msk.bf16.mxu1 %vm2633_vm1, %v2632_v9  ;;  %2504 = vmatpush3.bf16.msra.mxu1 %v2566_v52 }
0x175c   :  { %2505 = vmatprep.subr.bf16.mxu1 %v2632_v9  ;;  %v2211_v9 = vld [vmem:[%s3146_s3 + $0x1d] ss:$0 sm:$0xff] }
0x175f   :  { %2506 = vmatpush3.bf16.msra.mxu1 %v2567_v53 }
0x182d   :  { %v2032_v55 = vpop.f32.mrb[52].mxu1 }
0x182e   :  { %v2033_v56 = vadd.f32 %v2207_v54, %v2032_v55  ;;  %v2501_v57 = vpop.f32.mrb[53].mxu1 }
0x182f   :  { %v2035_v59 = vpop.f32.mrb[54].mxu1 }
0x1830   :  { %v2036_v60 = vadd.f32 %v2207_v54, %v2035_v59  ;;  %v2502_v58 = vpop.f32.mrb[55].mxu1  ;;  %2628 = vtanh.f32 %v2033_v56 }
0x1832   :  { %2630 = vtanh.f32 %v2036_v60 }
0x183a   :  { %v2629_v61 = vpop.eup %2628 }
0x183c   :  { %v2631_v62 = vpop.eup %2630 }
0x183d   :  { %v2041_v63 = vpack.c.bf16 %v2631_v62, %v2629_v61 }
0x183f   :  { %2508 = vmatmul.mubr.msk.bf16.vlgmr.msra.gmra.mrb[56].mxu1 %vm22_vm0, %v2041_v63 }
0x1912   :  { %v2100_v0 = vpop.f32.mrb[56].mxu1 }
0x1913   :  { %v2101_v1 = vadd.f32 %v2211_v9, %v2100_v0  ;;  %v2509_v2 = vpop.f32.mrb[57].mxu1 }
0x1914   :  { %v2103_v37 = vpop.f32.mrb[58].mxu1 }
0x1915   :  { %2107 = vst [vmem:[%s3148_s4] sm:$0xff] %v2101_v1  ;;  %v2104_v38 = vadd.f32 %v2211_v9, %v2103_v37  ;;  %v2510_v3 = vpop.f32.mrb[59].mxu1 }
0x1917   :  { %2108 = vst [vmem:[%s3148_s4 + $0x8] sm:$0xff] %v2104_v38 }

</bundles_post_ra>
